<compile_context>
chip_gen: v7x
topology: tpu7x:2x2x1
jax: 0.10.0
libtpu: 0.0.40
codegen_flags: <defaults>
</compile_context>

<pallas_src>
import functools

import jax
import jax.numpy as jnp
from jax import lax
from jax.experimental import pallas as pl
from jax.experimental.pallas import tpu as pltpu


def _attention_kernel(x_ref, wq_ref, wk_ref, wv_ref, bq_ref, bk_ref, bv_ref,
                      w1_ref, b1_ref, o_ref,
                      k_scr, v_scr, q_scr, o_scr, *, heads):
    """One grid step: one batch element, one TQ-row tile of queries."""
    N = x_ref.shape[1]
    D = x_ref.shape[2]
    TQ = o_ref.shape[1]
    dh = D // heads
    qt = pl.program_id(1)

    # ---- K / V projections: full-width [N, D] @ [D, D] MXU matmuls (bf16 in,
    # f32 accumulate), computed ONCE per batch element (qt == 0) and persisted
    # in VMEM scratch across all Q tiles (qt axis is sequential / "arbitrary").
    @pl.when(qt == 0)
    def _():
        xf = x_ref[0]                                                      # [N, D] bf16
        k = jnp.dot(xf, wk_ref[...], preferred_element_type=jnp.float32) + bk_ref[...]
        v = jnp.dot(xf, wv_ref[...], preferred_element_type=jnp.float32) + bv_ref[...]
        k_scr[...] = k.astype(jnp.bfloat16)
        v_scr[...] = v.astype(jnp.bfloat16)

    # ---- Q projection for this row tile (softmax scale pre-folded into wq/bq).
    if TQ == N:                      # single-tile case (toy shapes, ViT N=197)
        xq = x_ref[0]
    else:
        xq = x_ref[0, pl.ds(pl.multiple_of(qt * TQ, TQ), TQ), :]
    q_scr[...] = (jnp.dot(xq, wq_ref[...], preferred_element_type=jnp.float32)
                  + bq_ref[...]).astype(jnp.bfloat16)                      # [TQ, D]

    # ---- Per-head scores / softmax (f32) / PV.  `heads` is small & static,
    # so every head view is a static lane-subrange access on VMEM scratch.
    for h in range(heads):
        lo = h * dh
        q_h = q_scr[:, lo:lo + dh]                                         # [TQ, dh] bf16
        k_h = k_scr[:, lo:lo + dh]                                         # [N,  dh] bf16
        v_h = v_scr[:, lo:lo + dh]                                         # [N,  dh] bf16

        # q_h @ k_h^T without materializing a transposed copy of k_h.
        s = lax.dot_general(q_h, k_h, (((1,), (1,)), ((), ())),
                            preferred_element_type=jnp.float32)            # [TQ, N]

        # Numerically stable softmax in f32; reciprocal runs on the idle EUP.
        s = s - jnp.max(s, axis=-1, keepdims=True)
        e = jnp.exp(s)
        p = e * pl.reciprocal(jnp.sum(e, axis=-1, keepdims=True), approx=True)

        o_scr[:, lo:lo + dh] = jnp.dot(p.astype(jnp.bfloat16), v_h,
                                       preferred_element_type=jnp.float32
                                       ).astype(jnp.bfloat16)              # [TQ, dh]

    # ---- Fused head-concat + output projection: ONE [TQ, D] @ [D, D] matmul.
    out = jnp.dot(o_scr[...], w1_ref[...],
                  preferred_element_type=jnp.float32) + b1_ref[...]
    o_ref[0] = out.astype(o_ref.dtype)


def attention_forward(x, wqkv, bqkv, w1, b1, *, heads):
    """Forward of the ViT Attention module (eval mode).

    x:    [B, N, D]
    wqkv: [3D, D]   (torch nn.Linear convention: y = x @ W.T + b;
                     output columns are laid out as '(qkv h d)')
    bqkv: [3D]
    w1:   [D, D]
    b1:   [D]
    """
    B, N, D = x.shape
    assert D % heads == 0, "dim must be divisible by heads"
    scale = float(D) ** (-0.5)       # full-dim scale, as in the module

    # ---- host-side weight prep (done once): split the fused qkv weight, fold
    # the softmax scale into Q, transpose to matmul layout, and cast all MXU
    # operands to bf16.  Biases stay f32 (added to f32 accumulators, tiny DMA).
    W = wqkv.T                                                   # [D, 3D]
    wq = (W[:, :D] * scale).astype(jnp.bfloat16)                 # [D, D]
    wk = W[:, D:2 * D].astype(jnp.bfloat16)
    wv = W[:, 2 * D:].astype(jnp.bfloat16)
    bq = (bqkv[:D] * scale).reshape(1, D).astype(jnp.float32)
    bk = bqkv[D:2 * D].reshape(1, D).astype(jnp.float32)
    bv = bqkv[2 * D:].reshape(1, D).astype(jnp.float32)
    w1t = w1.T.astype(jnp.bfloat16)                              # [D, D]
    b1r = b1.reshape(1, D).astype(jnp.float32)
    x_bf = x.astype(jnp.bfloat16)

    # ---- Q-row tiling (flash-style): K/V computed once per batch element,
    # queries tiled.  256-row tiles amortize per-grid-step overhead on
    # v5e/v6e; falls back to 128, then to a single full-sequence tile.
    if N > 256 and N % 256 == 0:
        TQ = 256
    elif N > 128 and N % 128 == 0:
        TQ = 128
    else:
        TQ = N
    n_q_tiles = N // TQ

    const2 = lambda b, qt: (0, 0)

    grid_spec = pltpu.PrefetchScalarGridSpec(
        num_scalar_prefetch=0,
        grid=(B, n_q_tiles),
        in_specs=[
            # x: full sequence; block index constant across qt -> DMA'd once
            # per batch element (Q tile is sliced from it in-kernel).
            pl.BlockSpec((1, N, D), lambda b, qt: (b, 0, 0)),
            pl.BlockSpec((D, D), const2),     # Wq (pre-scaled, bf16)
            pl.BlockSpec((D, D), const2),     # Wk (bf16)
            pl.BlockSpec((D, D), const2),     # Wv (bf16)
            pl.BlockSpec((1, D), const2),     # bq (pre-scaled, f32)
            pl.BlockSpec((1, D), const2),     # bk (f32)
            pl.BlockSpec((1, D), const2),     # bv (f32)
            pl.BlockSpec((D, D), const2),     # W1^T (bf16)
            pl.BlockSpec((1, D), const2),     # b1 (f32)
        ],
        out_specs=pl.BlockSpec((1, TQ, D), lambda b, qt: (b, qt, 0)),
        scratch_shapes=[
            pltpu.VMEM((N, D), jnp.bfloat16),    # K, persists across Q tiles
            pltpu.VMEM((N, D), jnp.bfloat16),    # V, persists across Q tiles
            pltpu.VMEM((TQ, D), jnp.bfloat16),   # Q tile (head-sliced)
            pltpu.VMEM((TQ, D), jnp.bfloat16),   # head-concat buffer for nn1
        ],
    )

    return pl.pallas_call(
        functools.partial(_attention_kernel, heads=heads),
        out_shape=jax.ShapeDtypeStruct((B, N, D), x.dtype),
        grid_spec=grid_spec,
        compiler_params=pltpu.CompilerParams(
            # qt axis reuses the per-batch K/V scratch -> must stay sequential.
            dimension_semantics=("parallel", "arbitrary"),
            # Ample for these shapes; at production D=768 raise to ~48 MiB on
            # v7x (64 MiB VMEM) and 64-100 MiB on v5e/v6e (128 MiB VMEM).
            vmem_limit_bytes=32 * 1024 * 1024,
        ),
    )(x_bf, wq, wk, wv, bq, bk, bv, w1t, b1r)


def _xavier_uniform(key, out_f, in_f, dtype=jnp.float32):
    limit = (6.0 / (in_f + out_f)) ** 0.5
    return jax.random.uniform(key, (out_f, in_f), dtype, minval=-limit, maxval=limit)


def _reference(x, wqkv, bqkv, w1, b1, heads):
    B, N, D = x.shape
    d = D // heads
    scale = float(D) ** (-0.5)
    qkv = x @ wqkv.T + bqkv                                       # [B, N, 3D]
    qkv = qkv.reshape(B, N, 3, heads, d)
    q = jnp.transpose(qkv[:, :, 0], (0, 2, 1, 3))                 # [B, h, N, d]
    k = jnp.transpose(qkv[:, :, 1], (0, 2, 1, 3))
    v = jnp.transpose(qkv[:, :, 2], (0, 2, 1, 3))
    dots = jnp.einsum('bhid,bhjd->bhij', q, k) * scale
    attn = jax.nn.softmax(dots, axis=-1)
    out = jnp.einsum('bhij,bhjd->bhid', attn, v)                  # [B, h, N, d]
    out = jnp.transpose(out, (0, 2, 1, 3)).reshape(B, N, D)       # [B, N, D]
    return out @ w1.T + b1


if __name__ == "__main__":
    B, N, D, heads = 2, 8, 32, 8
    key = jax.random.PRNGKey(0)
    kx, kq, k1 = jax.random.split(key, 3)

    x = jax.random.normal(kx, (B, N, D), dtype=jnp.float32)

    # Deterministic parameter init mirroring the module's __init__.
    wqkv = _xavier_uniform(kq, 3 * D, D)          # nn.Linear(dim, 3*dim).weight
    bqkv = jnp.zeros((3 * D,), jnp.float32)       # zero-init bias
    w1 = _xavier_uniform(k1, D, D)                # nn.Linear(dim, dim).weight
    b1 = jnp.zeros((D,), jnp.float32)             # zero-init bias

    out = attention_forward(x, wqkv, bqkv, w1, b1, heads=heads)
    out = jax.block_until_ready(out)

    ref = _reference(x, wqkv, bqkv, w1, b1, heads)
    assert out.shape == (B, N, D)
    max_err = float(jnp.max(jnp.abs(out - ref)))
    # bf16 MXU operands + EUP approx reciprocal vs the exact-f32 reference.
    assert jnp.allclose(out, ref, atol=3e-2, rtol=3e-2), \
        f"mismatch vs reference (max abs err {max_err})"

    print("KERNEL_OK")
</pallas_src>

<mosaic_0001>
module attributes {stable_mosaic.version = 11 : i64} {
  func.func @_attention_kernel(%arg0: i32, %arg1: i32, %arg2: memref<1x8x32xbf16, #tpu.memory_space<vmem>>, %arg3: memref<32x32xbf16, #tpu.memory_space<vmem>>, %arg4: memref<32x32xbf16, #tpu.memory_space<vmem>>, %arg5: memref<32x32xbf16, #tpu.memory_space<vmem>>, %arg6: memref<1x32xf32, #tpu.memory_space<vmem>>, %arg7: memref<1x32xf32, #tpu.memory_space<vmem>>, %arg8: memref<1x32xf32, #tpu.memory_space<vmem>>, %arg9: memref<32x32xbf16, #tpu.memory_space<vmem>>, %arg10: memref<1x32xf32, #tpu.memory_space<vmem>>, %arg11: memref<1x8x32xf32, #tpu.memory_space<vmem>>, %arg12: memref<8x32xbf16, #tpu.memory_space<vmem>>, %arg13: memref<8x32xbf16, #tpu.memory_space<vmem>>, %arg14: memref<8x32xbf16, #tpu.memory_space<vmem>>, %arg15: memref<8x32xbf16, #tpu.memory_space<vmem>>) attributes {dimension_semantics = [#tpu.dimension_semantics<parallel>, #tpu.dimension_semantics<arbitrary>], iteration_bounds = array<i64: 2, 1>, scalar_prefetch = 0 : i64, scratch_operands = 4 : i64, tpu.core_type = #tpu.core_type<tc>, window_params = [{transform_indices = @transform_0, window_bounds = array<i64: 1, 8, 32>}, {pipeline_mode = #tpu.pipeline_mode<synchronous>, transform_indices = @transform_1, window_bounds = array<i64: 32, 32>}, {pipeline_mode = #tpu.pipeline_mode<synchronous>, transform_indices = @transform_2, window_bounds = array<i64: 32, 32>}, {pipeline_mode = #tpu.pipeline_mode<synchronous>, transform_indices = @transform_3, window_bounds = array<i64: 32, 32>}, {pipeline_mode = #tpu.pipeline_mode<synchronous>, transform_indices = @transform_4, window_bounds = array<i64: 1, 32>}, {pipeline_mode = #tpu.pipeline_mode<synchronous>, transform_indices = @transform_5, window_bounds = array<i64: 1, 32>}, {pipeline_mode = #tpu.pipeline_mode<synchronous>, transform_indices = @transform_6, window_bounds = array<i64: 1, 32>}, {pipeline_mode = #tpu.pipeline_mode<synchronous>, transform_indices = @transform_7, window_bounds = array<i64: 32, 32>}, {pipeline_mode = #tpu.pipeline_mode<synchronous>, transform_indices = @transform_8, window_bounds = array<i64: 1, 32>}, {transform_indices = @transform_9, window_bounds = array<i64: 1, 8, 32>}]} {
    %c0_i32 = arith.constant 0 : i32
    %0 = arith.cmpi eq, %arg1, %c0_i32 : i32
    %1 = arith.extui %0 : i1 to i32
    %c0_i32_0 = arith.constant 0 : i32
    %2 = arith.cmpi ne, %1, %c0_i32_0 : i32
    scf.if %2 {
      %c0_108 = arith.constant 0 : index
      %c0_109 = arith.constant 0 : index
      %c0_110 = arith.constant 0 : index
      %165 = vector.load %arg2[%c0_108, %c0_109, %c0_110] : memref<1x8x32xbf16, #tpu.memory_space<vmem>>, vector<1x8x32xbf16>
      %166 = vector.shape_cast %165 : vector<1x8x32xbf16> to vector<8x32xbf16>
      %c0_111 = arith.constant 0 : index
      %c0_112 = arith.constant 0 : index
      %167 = vector.load %arg4[%c0_111, %c0_112] : memref<32x32xbf16, #tpu.memory_space<vmem>>, vector<32x32xbf16>
      %cst_113 = arith.constant dense<0.000000e+00> : vector<8x32xf32>
      %168 = tpu.matmul %166, %167, %cst_113 {dimension_numbers = #tpu.dot_dimension_numbers<[1], [0], [0], [1], [0, 0, 1, 1], [], []>} : vector<8x32xbf16>, vector<32x32xbf16>, vector<8x32xf32> -> vector<8x32xf32>
      %c0_114 = arith.constant 0 : index
      %c0_115 = arith.constant 0 : index
      %169 = vector.load %arg7[%c0_114, %c0_115] : memref<1x32xf32, #tpu.memory_space<vmem>>, vector<1x32xf32>
      %170 = vector.broadcast %169 : vector<1x32xf32> to vector<8x32xf32>
      %171 = arith.addf %168, %170 : vector<8x32xf32>
      %c0_116 = arith.constant 0 : index
      %c0_117 = arith.constant 0 : index
      %172 = vector.load %arg5[%c0_116, %c0_117] : memref<32x32xbf16, #tpu.memory_space<vmem>>, vector<32x32xbf16>
      %cst_118 = arith.constant dense<0.000000e+00> : vector<8x32xf32>
      %173 = tpu.matmul %166, %172, %cst_118 {dimension_numbers = #tpu.dot_dimension_numbers<[1], [0], [0], [1], [0, 0, 1, 1], [], []>} : vector<8x32xbf16>, vector<32x32xbf16>, vector<8x32xf32> -> vector<8x32xf32>
      %c0_119 = arith.constant 0 : index
      %c0_120 = arith.constant 0 : index
      %174 = vector.load %arg8[%c0_119, %c0_120] : memref<1x32xf32, #tpu.memory_space<vmem>>, vector<1x32xf32>
      %175 = vector.broadcast %174 : vector<1x32xf32> to vector<8x32xf32>
      %176 = arith.addf %173, %175 : vector<8x32xf32>
      %177 = arith.truncf %171 : vector<8x32xf32> to vector<8x32xbf16>
      %c0_121 = arith.constant 0 : index
      %c0_122 = arith.constant 0 : index
      %178 = vector.load %arg12[%c0_121, %c0_122] : memref<8x32xbf16, #tpu.memory_space<vmem>>, vector<8x32xbf16>
      tpu.vector_store %arg12[%c0_121, %c0_122], %177 {strides = array<i32>} : memref<8x32xbf16, #tpu.memory_space<vmem>>, vector<8x32xbf16>,
      %179 = arith.truncf %176 : vector<8x32xf32> to vector<8x32xbf16>
      %c0_123 = arith.constant 0 : index
      %c0_124 = arith.constant 0 : index
      %180 = vector.load %arg13[%c0_123, %c0_124] : memref<8x32xbf16, #tpu.memory_space<vmem>>, vector<8x32xbf16>
      tpu.vector_store %arg13[%c0_123, %c0_124], %179 {strides = array<i32>} : memref<8x32xbf16, #tpu.memory_space<vmem>>, vector<8x32xbf16>,
    } else {
    }
    %c0 = arith.constant 0 : index
    %c0_1 = arith.constant 0 : index
    %c0_2 = arith.constant 0 : index
    %3 = vector.load %arg2[%c0, %c0_1, %c0_2] : memref<1x8x32xbf16, #tpu.memory_space<vmem>>, vector<1x8x32xbf16>
    %4 = vector.shape_cast %3 : vector<1x8x32xbf16> to vector<8x32xbf16>
    %c0_3 = arith.constant 0 : index
    %c0_4 = arith.constant 0 : index
    %5 = vector.load %arg3[%c0_3, %c0_4] : memref<32x32xbf16, #tpu.memory_space<vmem>>, vector<32x32xbf16>
    %cst = arith.constant dense<0.000000e+00> : vector<8x32xf32>
    %6 = tpu.matmul %4, %5, %cst {dimension_numbers = #tpu.dot_dimension_numbers<[1], [0], [0], [1], [0, 0, 1, 1], [], []>} : vector<8x32xbf16>, vector<32x32xbf16>, vector<8x32xf32> -> vector<8x32xf32>
    %c0_5 = arith.constant 0 : index
    %c0_6 = arith.constant 0 : index
    %7 = vector.load %arg6[%c0_5, %c0_6] : memref<1x32xf32, #tpu.memory_space<vmem>>, vector<1x32xf32>
    %8 = vector.broadcast %7 : vector<1x32xf32> to vector<8x32xf32>
    %9 = arith.addf %6, %8 : vector<8x32xf32>
    %10 = arith.truncf %9 : vector<8x32xf32> to vector<8x32xbf16>
    %c0_7 = arith.constant 0 : index
    %c0_8 = arith.constant 0 : index
    %11 = vector.load %arg14[%c0_7, %c0_8] : memref<8x32xbf16, #tpu.memory_space<vmem>>, vector<8x32xbf16>
    tpu.vector_store %arg14[%c0_7, %c0_8], %10 {strides = array<i32>} : memref<8x32xbf16, #tpu.memory_space<vmem>>, vector<8x32xbf16>,
    %c0_9 = arith.constant 0 : index
    %c0_10 = arith.constant 0 : index
    %12 = vector.load %arg14[%c0_9, %c0_10] : memref<8x32xbf16, #tpu.memory_space<vmem>>, vector<8x4xbf16>
    %c0_11 = arith.constant 0 : index
    %c0_12 = arith.constant 0 : index
    %13 = vector.load %arg12[%c0_11, %c0_12] : memref<8x32xbf16, #tpu.memory_space<vmem>>, vector<8x4xbf16>
    %c0_13 = arith.constant 0 : index
    %c0_14 = arith.constant 0 : index
    %14 = vector.load %arg13[%c0_13, %c0_14] : memref<8x32xbf16, #tpu.memory_space<vmem>>, vector<8x4xbf16>
    %cst_15 = arith.constant dense<0.000000e+00> : vector<8x8xf32>
    %15 = tpu.matmul %12, %13, %cst_15 {dimension_numbers = #tpu.dot_dimension_numbers<[1], [1], [0], [0], [0, 0, 1, 0], [], []>} : vector<8x4xbf16>, vector<8x4xbf16>, vector<8x8xf32> -> vector<8x8xf32>
    %cst_16 = arith.constant dense<0xFF800000> : vector<8xf32>
    %16 = vector.multi_reduction <maximumf>, %15, %cst_16 [1] : vector<8x8xf32> to vector<8xf32>
    %17 = vector.shape_cast %16 : vector<8xf32> to vector<8x1xf32>
    %18 = vector.broadcast %17 : vector<8x1xf32> to vector<8x8xf32>
    %19 = arith.subf %15, %18 : vector<8x8xf32>
    %20 = math.exp %19 : vector<8x8xf32>
    %cst_17 = arith.constant dense<0.000000e+00> : vector<8xf32>
    %21 = vector.multi_reduction <add>, %20, %cst_17 [1] : vector<8x8xf32> to vector<8xf32>
    %22 = vector.shape_cast %21 : vector<8xf32> to vector<8x1xf32>
    %23 = tpu.reciprocal %22 {approx = true} : vector<8x1xf32> -> vector<8x1xf32>
    %24 = vector.broadcast %23 : vector<8x1xf32> to vector<8x8xf32>
    %25 = arith.mulf %20, %24 : vector<8x8xf32>
    %26 = arith.truncf %25 : vector<8x8xf32> to vector<8x8xbf16>
    %cst_18 = arith.constant dense<0.000000e+00> : vector<8x4xf32>
    %27 = tpu.matmul %26, %14, %cst_18 {dimension_numbers = #tpu.dot_dimension_numbers<[1], [0], [0], [1], [0, 0, 1, 1], [], []>} : vector<8x8xbf16>, vector<8x4xbf16>, vector<8x4xf32> -> vector<8x4xf32>
    %28 = arith.truncf %27 : vector<8x4xf32> to vector<8x4xbf16>
    %c0_19 = arith.constant 0 : index
    %c0_20 = arith.constant 0 : index
    %29 = vector.load %arg15[%c0_19, %c0_20] : memref<8x32xbf16, #tpu.memory_space<vmem>>, vector<8x4xbf16>
    tpu.vector_store %arg15[%c0_19, %c0_20], %28 {strides = array<i32>} : memref<8x32xbf16, #tpu.memory_space<vmem>>, vector<8x4xbf16>,
    %c0_21 = arith.constant 0 : index
    %c4 = arith.constant 4 : index
    %30 = vector.load %arg14[%c0_21, %c4] : memref<8x32xbf16, #tpu.memory_space<vmem>>, vector<8x4xbf16>
    %c0_22 = arith.constant 0 : index
    %c4_23 = arith.constant 4 : index
    %31 = vector.load %arg12[%c0_22, %c4_23] : memref<8x32xbf16, #tpu.memory_space<vmem>>, vector<8x4xbf16>
    %c0_24 = arith.constant 0 : index
    %c4_25 = arith.constant 4 : index
    %32 = vector.load %arg13[%c0_24, %c4_25] : memref<8x32xbf16, #tpu.memory_space<vmem>>, vector<8x4xbf16>
    %cst_26 = arith.constant dense<0.000000e+00> : vector<8x8xf32>
    %33 = tpu.matmul %30, %31, %cst_26 {dimension_numbers = #tpu.dot_dimension_numbers<[1], [1], [0], [0], [0, 0, 1, 0], [], []>} : vector<8x4xbf16>, vector<8x4xbf16>, vector<8x8xf32> -> vector<8x8xf32>
    %cst_27 = arith.constant dense<0xFF800000> : vector<8xf32>
    %34 = vector.multi_reduction <maximumf>, %33, %cst_27 [1] : vector<8x8xf32> to vector<8xf32>
    %35 = vector.shape_cast %34 : vector<8xf32> to vector<8x1xf32>
    %36 = vector.broadcast %35 : vector<8x1xf32> to vector<8x8xf32>
    %37 = arith.subf %33, %36 : vector<8x8xf32>
    %38 = math.exp %37 : vector<8x8xf32>
    %cst_28 = arith.constant dense<0.000000e+00> : vector<8xf32>
    %39 = vector.multi_reduction <add>, %38, %cst_28 [1] : vector<8x8xf32> to vector<8xf32>
    %40 = vector.shape_cast %39 : vector<8xf32> to vector<8x1xf32>
    %41 = tpu.reciprocal %40 {approx = true} : vector<8x1xf32> -> vector<8x1xf32>
    %42 = vector.broadcast %41 : vector<8x1xf32> to vector<8x8xf32>
    %43 = arith.mulf %38, %42 : vector<8x8xf32>
    %44 = arith.truncf %43 : vector<8x8xf32> to vector<8x8xbf16>
    %cst_29 = arith.constant dense<0.000000e+00> : vector<8x4xf32>
    %45 = tpu.matmul %44, %32, %cst_29 {dimension_numbers = #tpu.dot_dimension_numbers<[1], [0], [0], [1], [0, 0, 1, 1], [], []>} : vector<8x8xbf16>, vector<8x4xbf16>, vector<8x4xf32> -> vector<8x4xf32>
    %46 = arith.truncf %45 : vector<8x4xf32> to vector<8x4xbf16>
    %c0_30 = arith.constant 0 : index
    %c4_31 = arith.constant 4 : index
    %47 = vector.load %arg15[%c0_30, %c4_31] : memref<8x32xbf16, #tpu.memory_space<vmem>>, vector<8x4xbf16>
    tpu.vector_store %arg15[%c0_30, %c4_31], %46 {strides = array<i32>} : memref<8x32xbf16, #tpu.memory_space<vmem>>, vector<8x4xbf16>,
    %c0_32 = arith.constant 0 : index
    %c8 = arith.constant 8 : index
    %48 = vector.load %arg14[%c0_32, %c8] : memref<8x32xbf16, #tpu.memory_space<vmem>>, vector<8x4xbf16>
    %c0_33 = arith.constant 0 : index
    %c8_34 = arith.constant 8 : index
    %49 = vector.load %arg12[%c0_33, %c8_34] : memref<8x32xbf16, #tpu.memory_space<vmem>>, vector<8x4xbf16>
    %c0_35 = arith.constant 0 : index
    %c8_36 = arith.constant 8 : index
    %50 = vector.load %arg13[%c0_35, %c8_36] : memref<8x32xbf16, #tpu.memory_space<vmem>>, vector<8x4xbf16>
    %cst_37 = arith.constant dense<0.000000e+00> : vector<8x8xf32>
    %51 = tpu.matmul %48, %49, %cst_37 {dimension_numbers = #tpu.dot_dimension_numbers<[1], [1], [0], [0], [0, 0, 1, 0], [], []>} : vector<8x4xbf16>, vector<8x4xbf16>, vector<8x8xf32> -> vector<8x8xf32>
    %cst_38 = arith.constant dense<0xFF800000> : vector<8xf32>
    %52 = vector.multi_reduction <maximumf>, %51, %cst_38 [1] : vector<8x8xf32> to vector<8xf32>
    %53 = vector.shape_cast %52 : vector<8xf32> to vector<8x1xf32>
    %54 = vector.broadcast %53 : vector<8x1xf32> to vector<8x8xf32>
    %55 = arith.subf %51, %54 : vector<8x8xf32>
    %56 = math.exp %55 : vector<8x8xf32>
    %cst_39 = arith.constant dense<0.000000e+00> : vector<8xf32>
    %57 = vector.multi_reduction <add>, %56, %cst_39 [1] : vector<8x8xf32> to vector<8xf32>
    %58 = vector.shape_cast %57 : vector<8xf32> to vector<8x1xf32>
    %59 = tpu.reciprocal %58 {approx = true} : vector<8x1xf32> -> vector<8x1xf32>
    %60 = vector.broadcast %59 : vector<8x1xf32> to vector<8x8xf32>
    %61 = arith.mulf %56, %60 : vector<8x8xf32>
    %62 = arith.truncf %61 : vector<8x8xf32> to vector<8x8xbf16>
    %cst_40 = arith.constant dense<0.000000e+00> : vector<8x4xf32>
    %63 = tpu.matmul %62, %50, %cst_40 {dimension_numbers = #tpu.dot_dimension_numbers<[1], [0], [0], [1], [0, 0, 1, 1], [], []>} : vector<8x8xbf16>, vector<8x4xbf16>, vector<8x4xf32> -> vector<8x4xf32>
    %64 = arith.truncf %63 : vector<8x4xf32> to vector<8x4xbf16>
    %c0_41 = arith.constant 0 : index
    %c8_42 = arith.constant 8 : index
    %65 = vector.load %arg15[%c0_41, %c8_42] : memref<8x32xbf16, #tpu.memory_space<vmem>>, vector<8x4xbf16>
    tpu.vector_store %arg15[%c0_41, %c8_42], %64 {strides = array<i32>} : memref<8x32xbf16, #tpu.memory_space<vmem>>, vector<8x4xbf16>,
    %c0_43 = arith.constant 0 : index
    %c12 = arith.constant 12 : index
    %66 = vector.load %arg14[%c0_43, %c12] : memref<8x32xbf16, #tpu.memory_space<vmem>>, vector<8x4xbf16>
    %c0_44 = arith.constant 0 : index
    %c12_45 = arith.constant 12 : index
    %67 = vector.load %arg12[%c0_44, %c12_45] : memref<8x32xbf16, #tpu.memory_space<vmem>>, vector<8x4xbf16>
    %c0_46 = arith.constant 0 : index
    %c12_47 = arith.constant 12 : index
    %68 = vector.load %arg13[%c0_46, %c12_47] : memref<8x32xbf16, #tpu.memory_space<vmem>>, vector<8x4xbf16>
    %cst_48 = arith.constant dense<0.000000e+00> : vector<8x8xf32>
    %69 = tpu.matmul %66, %67, %cst_48 {dimension_numbers = #tpu.dot_dimension_numbers<[1], [1], [0], [0], [0, 0, 1, 0], [], []>} : vector<8x4xbf16>, vector<8x4xbf16>, vector<8x8xf32> -> vector<8x8xf32>
    %cst_49 = arith.constant dense<0xFF800000> : vector<8xf32>
    %70 = vector.multi_reduction <maximumf>, %69, %cst_49 [1] : vector<8x8xf32> to vector<8xf32>
    %71 = vector.shape_cast %70 : vector<8xf32> to vector<8x1xf32>
    %72 = vector.broadcast %71 : vector<8x1xf32> to vector<8x8xf32>
    %73 = arith.subf %69, %72 : vector<8x8xf32>
    %74 = math.exp %73 : vector<8x8xf32>
    %cst_50 = arith.constant dense<0.000000e+00> : vector<8xf32>
    %75 = vector.multi_reduction <add>, %74, %cst_50 [1] : vector<8x8xf32> to vector<8xf32>
    %76 = vector.shape_cast %75 : vector<8xf32> to vector<8x1xf32>
    %77 = tpu.reciprocal %76 {approx = true} : vector<8x1xf32> -> vector<8x1xf32>
    %78 = vector.broadcast %77 : vector<8x1xf32> to vector<8x8xf32>
    %79 = arith.mulf %74, %78 : vector<8x8xf32>
    %80 = arith.truncf %79 : vector<8x8xf32> to vector<8x8xbf16>
    %cst_51 = arith.constant dense<0.000000e+00> : vector<8x4xf32>
    %81 = tpu.matmul %80, %68, %cst_51 {dimension_numbers = #tpu.dot_dimension_numbers<[1], [0], [0], [1], [0, 0, 1, 1], [], []>} : vector<8x8xbf16>, vector<8x4xbf16>, vector<8x4xf32> -> vector<8x4xf32>
    %82 = arith.truncf %81 : vector<8x4xf32> to vector<8x4xbf16>
    %c0_52 = arith.constant 0 : index
    %c12_53 = arith.constant 12 : index
    %83 = vector.load %arg15[%c0_52, %c12_53] : memref<8x32xbf16, #tpu.memory_space<vmem>>, vector<8x4xbf16>
    tpu.vector_store %arg15[%c0_52, %c12_53], %82 {strides = array<i32>} : memref<8x32xbf16, #tpu.memory_space<vmem>>, vector<8x4xbf16>,
    %c0_54 = arith.constant 0 : index
    %c16 = arith.constant 16 : index
    %84 = vector.load %arg14[%c0_54, %c16] : memref<8x32xbf16, #tpu.memory_space<vmem>>, vector<8x4xbf16>
    %c0_55 = arith.constant 0 : index
    %c16_56 = arith.constant 16 : index
    %85 = vector.load %arg12[%c0_55, %c16_56] : memref<8x32xbf16, #tpu.memory_space<vmem>>, vector<8x4xbf16>
    %c0_57 = arith.constant 0 : index
    %c16_58 = arith.constant 16 : index
    %86 = vector.load %arg13[%c0_57, %c16_58] : memref<8x32xbf16, #tpu.memory_space<vmem>>, vector<8x4xbf16>
    %cst_59 = arith.constant dense<0.000000e+00> : vector<8x8xf32>
    %87 = tpu.matmul %84, %85, %cst_59 {dimension_numbers = #tpu.dot_dimension_numbers<[1], [1], [0], [0], [0, 0, 1, 0], [], []>} : vector<8x4xbf16>, vector<8x4xbf16>, vector<8x8xf32> -> vector<8x8xf32>
    %cst_60 = arith.constant dense<0xFF800000> : vector<8xf32>
    %88 = vector.multi_reduction <maximumf>, %87, %cst_60 [1] : vector<8x8xf32> to vector<8xf32>
    %89 = vector.shape_cast %88 : vector<8xf32> to vector<8x1xf32>
    %90 = vector.broadcast %89 : vector<8x1xf32> to vector<8x8xf32>
    %91 = arith.subf %87, %90 : vector<8x8xf32>
    %92 = math.exp %91 : vector<8x8xf32>
    %cst_61 = arith.constant dense<0.000000e+00> : vector<8xf32>
    %93 = vector.multi_reduction <add>, %92, %cst_61 [1] : vector<8x8xf32> to vector<8xf32>
    %94 = vector.shape_cast %93 : vector<8xf32> to vector<8x1xf32>
    %95 = tpu.reciprocal %94 {approx = true} : vector<8x1xf32> -> vector<8x1xf32>
    %96 = vector.broadcast %95 : vector<8x1xf32> to vector<8x8xf32>
    %97 = arith.mulf %92, %96 : vector<8x8xf32>
    %98 = arith.truncf %97 : vector<8x8xf32> to vector<8x8xbf16>
    %cst_62 = arith.constant dense<0.000000e+00> : vector<8x4xf32>
    %99 = tpu.matmul %98, %86, %cst_62 {dimension_numbers = #tpu.dot_dimension_numbers<[1], [0], [0], [1], [0, 0, 1, 1], [], []>} : vector<8x8xbf16>, vector<8x4xbf16>, vector<8x4xf32> -> vector<8x4xf32>
    %100 = arith.truncf %99 : vector<8x4xf32> to vector<8x4xbf16>
    %c0_63 = arith.constant 0 : index
    %c16_64 = arith.constant 16 : index
    %101 = vector.load %arg15[%c0_63, %c16_64] : memref<8x32xbf16, #tpu.memory_space<vmem>>, vector<8x4xbf16>
    tpu.vector_store %arg15[%c0_63, %c16_64], %100 {strides = array<i32>} : memref<8x32xbf16, #tpu.memory_space<vmem>>, vector<8x4xbf16>,
    %c0_65 = arith.constant 0 : index
    %c20 = arith.constant 20 : index
    %102 = vector.load %arg14[%c0_65, %c20] : memref<8x32xbf16, #tpu.memory_space<vmem>>, vector<8x4xbf16>
    %c0_66 = arith.constant 0 : index
    %c20_67 = arith.constant 20 : index
    %103 = vector.load %arg12[%c0_66, %c20_67] : memref<8x32xbf16, #tpu.memory_space<vmem>>, vector<8x4xbf16>
    %c0_68 = arith.constant 0 : index
    %c20_69 = arith.constant 20 : index
    %104 = vector.load %arg13[%c0_68, %c20_69] : memref<8x32xbf16, #tpu.memory_space<vmem>>, vector<8x4xbf16>
    %cst_70 = arith.constant dense<0.000000e+00> : vector<8x8xf32>
    %105 = tpu.matmul %102, %103, %cst_70 {dimension_numbers = #tpu.dot_dimension_numbers<[1], [1], [0], [0], [0, 0, 1, 0], [], []>} : vector<8x4xbf16>, vector<8x4xbf16>, vector<8x8xf32> -> vector<8x8xf32>
    %cst_71 = arith.constant dense<0xFF800000> : vector<8xf32>
    %106 = vector.multi_reduction <maximumf>, %105, %cst_71 [1] : vector<8x8xf32> to vector<8xf32>
    %107 = vector.shape_cast %106 : vector<8xf32> to vector<8x1xf32>
    %108 = vector.broadcast %107 : vector<8x1xf32> to vector<8x8xf32>
    %109 = arith.subf %105, %108 : vector<8x8xf32>
    %110 = math.exp %109 : vector<8x8xf32>
    %cst_72 = arith.constant dense<0.000000e+00> : vector<8xf32>
    %111 = vector.multi_reduction <add>, %110, %cst_72 [1] : vector<8x8xf32> to vector<8xf32>
    %112 = vector.shape_cast %111 : vector<8xf32> to vector<8x1xf32>
    %113 = tpu.reciprocal %112 {approx = true} : vector<8x1xf32> -> vector<8x1xf32>
    %114 = vector.broadcast %113 : vector<8x1xf32> to vector<8x8xf32>
    %115 = arith.mulf %110, %114 : vector<8x8xf32>
    %116 = arith.truncf %115 : vector<8x8xf32> to vector<8x8xbf16>
    %cst_73 = arith.constant dense<0.000000e+00> : vector<8x4xf32>
    %117 = tpu.matmul %116, %104, %cst_73 {dimension_numbers = #tpu.dot_dimension_numbers<[1], [0], [0], [1], [0, 0, 1, 1], [], []>} : vector<8x8xbf16>, vector<8x4xbf16>, vector<8x4xf32> -> vector<8x4xf32>
    %118 = arith.truncf %117 : vector<8x4xf32> to vector<8x4xbf16>
    %c0_74 = arith.constant 0 : index
    %c20_75 = arith.constant 20 : index
    %119 = vector.load %arg15[%c0_74, %c20_75] : memref<8x32xbf16, #tpu.memory_space<vmem>>, vector<8x4xbf16>
    tpu.vector_store %arg15[%c0_74, %c20_75], %118 {strides = array<i32>} : memref<8x32xbf16, #tpu.memory_space<vmem>>, vector<8x4xbf16>,
    %c0_76 = arith.constant 0 : index
    %c24 = arith.constant 24 : index
    %120 = vector.load %arg14[%c0_76, %c24] : memref<8x32xbf16, #tpu.memory_space<vmem>>, vector<8x4xbf16>
    %c0_77 = arith.constant 0 : index
    %c24_78 = arith.constant 24 : index
    %121 = vector.load %arg12[%c0_77, %c24_78] : memref<8x32xbf16, #tpu.memory_space<vmem>>, vector<8x4xbf16>
    %c0_79 = arith.constant 0 : index
    %c24_80 = arith.constant 24 : index
    %122 = vector.load %arg13[%c0_79, %c24_80] : memref<8x32xbf16, #tpu.memory_space<vmem>>, vector<8x4xbf16>
    %cst_81 = arith.constant dense<0.000000e+00> : vector<8x8xf32>
    %123 = tpu.matmul %120, %121, %cst_81 {dimension_numbers = #tpu.dot_dimension_numbers<[1], [1], [0], [0], [0, 0, 1, 0], [], []>} : vector<8x4xbf16>, vector<8x4xbf16>, vector<8x8xf32> -> vector<8x8xf32>
    %cst_82 = arith.constant dense<0xFF800000> : vector<8xf32>
    %124 = vector.multi_reduction <maximumf>, %123, %cst_82 [1] : vector<8x8xf32> to vector<8xf32>
    %125 = vector.shape_cast %124 : vector<8xf32> to vector<8x1xf32>
    %126 = vector.broadcast %125 : vector<8x1xf32> to vector<8x8xf32>
    %127 = arith.subf %123, %126 : vector<8x8xf32>
    %128 = math.exp %127 : vector<8x8xf32>
    %cst_83 = arith.constant dense<0.000000e+00> : vector<8xf32>
    %129 = vector.multi_reduction <add>, %128, %cst_83 [1] : vector<8x8xf32> to vector<8xf32>
    %130 = vector.shape_cast %129 : vector<8xf32> to vector<8x1xf32>
    %131 = tpu.reciprocal %130 {approx = true} : vector<8x1xf32> -> vector<8x1xf32>
    %132 = vector.broadcast %131 : vector<8x1xf32> to vector<8x8xf32>
    %133 = arith.mulf %128, %132 : vector<8x8xf32>
    %134 = arith.truncf %133 : vector<8x8xf32> to vector<8x8xbf16>
    %cst_84 = arith.constant dense<0.000000e+00> : vector<8x4xf32>
    %135 = tpu.matmul %134, %122, %cst_84 {dimension_numbers = #tpu.dot_dimension_numbers<[1], [0], [0], [1], [0, 0, 1, 1], [], []>} : vector<8x8xbf16>, vector<8x4xbf16>, vector<8x4xf32> -> vector<8x4xf32>
    %136 = arith.truncf %135 : vector<8x4xf32> to vector<8x4xbf16>
    %c0_85 = arith.constant 0 : index
    %c24_86 = arith.constant 24 : index
    %137 = vector.load %arg15[%c0_85, %c24_86] : memref<8x32xbf16, #tpu.memory_space<vmem>>, vector<8x4xbf16>
    tpu.vector_store %arg15[%c0_85, %c24_86], %136 {strides = array<i32>} : memref<8x32xbf16, #tpu.memory_space<vmem>>, vector<8x4xbf16>,
    %c0_87 = arith.constant 0 : index
    %c28 = arith.constant 28 : index
    %138 = vector.load %arg14[%c0_87, %c28] : memref<8x32xbf16, #tpu.memory_space<vmem>>, vector<8x4xbf16>
    %c0_88 = arith.constant 0 : index
    %c28_89 = arith.constant 28 : index
    %139 = vector.load %arg12[%c0_88, %c28_89] : memref<8x32xbf16, #tpu.memory_space<vmem>>, vector<8x4xbf16>
    %c0_90 = arith.constant 0 : index
    %c28_91 = arith.constant 28 : index
    %140 = vector.load %arg13[%c0_90, %c28_91] : memref<8x32xbf16, #tpu.memory_space<vmem>>, vector<8x4xbf16>
    %cst_92 = arith.constant dense<0.000000e+00> : vector<8x8xf32>
    %141 = tpu.matmul %138, %139, %cst_92 {dimension_numbers = #tpu.dot_dimension_numbers<[1], [1], [0], [0], [0, 0, 1, 0], [], []>} : vector<8x4xbf16>, vector<8x4xbf16>, vector<8x8xf32> -> vector<8x8xf32>
    %cst_93 = arith.constant dense<0xFF800000> : vector<8xf32>
    %142 = vector.multi_reduction <maximumf>, %141, %cst_93 [1] : vector<8x8xf32> to vector<8xf32>
    %143 = vector.shape_cast %142 : vector<8xf32> to vector<8x1xf32>
    %144 = vector.broadcast %143 : vector<8x1xf32> to vector<8x8xf32>
    %145 = arith.subf %141, %144 : vector<8x8xf32>
    %146 = math.exp %145 : vector<8x8xf32>
    %cst_94 = arith.constant dense<0.000000e+00> : vector<8xf32>
    %147 = vector.multi_reduction <add>, %146, %cst_94 [1] : vector<8x8xf32> to vector<8xf32>
    %148 = vector.shape_cast %147 : vector<8xf32> to vector<8x1xf32>
    %149 = tpu.reciprocal %148 {approx = true} : vector<8x1xf32> -> vector<8x1xf32>
    %150 = vector.broadcast %149 : vector<8x1xf32> to vector<8x8xf32>
    %151 = arith.mulf %146, %150 : vector<8x8xf32>
    %152 = arith.truncf %151 : vector<8x8xf32> to vector<8x8xbf16>
    %cst_95 = arith.constant dense<0.000000e+00> : vector<8x4xf32>
    %153 = tpu.matmul %152, %140, %cst_95 {dimension_numbers = #tpu.dot_dimension_numbers<[1], [0], [0], [1], [0, 0, 1, 1], [], []>} : vector<8x8xbf16>, vector<8x4xbf16>, vector<8x4xf32> -> vector<8x4xf32>
    %154 = arith.truncf %153 : vector<8x4xf32> to vector<8x4xbf16>
    %c0_96 = arith.constant 0 : index
    %c28_97 = arith.constant 28 : index
    %155 = vector.load %arg15[%c0_96, %c28_97] : memref<8x32xbf16, #tpu.memory_space<vmem>>, vector<8x4xbf16>
    tpu.vector_store %arg15[%c0_96, %c28_97], %154 {strides = array<i32>} : memref<8x32xbf16, #tpu.memory_space<vmem>>, vector<8x4xbf16>,
    %c0_98 = arith.constant 0 : index
    %c0_99 = arith.constant 0 : index
    %156 = vector.load %arg15[%c0_98, %c0_99] : memref<8x32xbf16, #tpu.memory_space<vmem>>, vector<8x32xbf16>
    %c0_100 = arith.constant 0 : index
    %c0_101 = arith.constant 0 : index
    %157 = vector.load %arg9[%c0_100, %c0_101] : memref<32x32xbf16, #tpu.memory_space<vmem>>, vector<32x32xbf16>
    %cst_102 = arith.constant dense<0.000000e+00> : vector<8x32xf32>
    %158 = tpu.matmul %156, %157, %cst_102 {dimension_numbers = #tpu.dot_dimension_numbers<[1], [0], [0], [1], [0, 0, 1, 1], [], []>} : vector<8x32xbf16>, vector<32x32xbf16>, vector<8x32xf32> -> vector<8x32xf32>
    %c0_103 = arith.constant 0 : index
    %c0_104 = arith.constant 0 : index
    %159 = vector.load %arg10[%c0_103, %c0_104] : memref<1x32xf32, #tpu.memory_space<vmem>>, vector<1x32xf32>
    %160 = vector.broadcast %159 : vector<1x32xf32> to vector<8x32xf32>
    %161 = arith.addf %158, %160 : vector<8x32xf32>
    %c0_105 = arith.constant 0 : index
    %c0_106 = arith.constant 0 : index
    %c0_107 = arith.constant 0 : index
    %162 = vector.load %arg11[%c0_105, %c0_106, %c0_107] : memref<1x8x32xf32, #tpu.memory_space<vmem>>, vector<1x8x32xf32>
    %163 = vector.shape_cast %162 : vector<1x8x32xf32> to vector<8x32xf32>
    %164 = vector.shape_cast %161 : vector<8x32xf32> to vector<1x8x32xf32>
    tpu.vector_store %arg11[%c0_105, %c0_106, %c0_107], %164 {strides = array<i32>} : memref<1x8x32xf32, #tpu.memory_space<vmem>>, vector<1x8x32xf32>,
    return
  }
  func.func @transform_0(%arg0: i32, %arg1: i32) -> (i32, i32, i32) {
    %c0_i32 = arith.constant 0 : i32
    %c0_i32_0 = arith.constant 0 : i32
    %c0_i32_1 = arith.constant 0 : i32
    return %arg0, %c0_i32, %c0_i32_0 : i32, i32, i32
  }
  func.func @transform_1(%arg0: i32, %arg1: i32) -> (i32, i32) {
    %c0_i32 = arith.constant 0 : i32
    %c0_i32_0 = arith.constant 0 : i32
    %c0_i32_1 = arith.constant 0 : i32
    return %c0_i32, %c0_i32_0 : i32, i32
  }
  func.func @transform_2(%arg0: i32, %arg1: i32) -> (i32, i32) {
    %c0_i32 = arith.constant 0 : i32
    %c0_i32_0 = arith.constant 0 : i32
    %c0_i32_1 = arith.constant 0 : i32
    return %c0_i32, %c0_i32_0 : i32, i32
  }
  func.func @transform_3(%arg0: i32, %arg1: i32) -> (i32, i32) {
    %c0_i32 = arith.constant 0 : i32
    %c0_i32_0 = arith.constant 0 : i32
    %c0_i32_1 = arith.constant 0 : i32
    return %c0_i32, %c0_i32_0 : i32, i32
  }
  func.func @transform_4(%arg0: i32, %arg1: i32) -> (i32, i32) {
    %c0_i32 = arith.constant 0 : i32
    %c0_i32_0 = arith.constant 0 : i32
    %c0_i32_1 = arith.constant 0 : i32
    return %c0_i32, %c0_i32_0 : i32, i32
  }
  func.func @transform_5(%arg0: i32, %arg1: i32) -> (i32, i32) {
    %c0_i32 = arith.constant 0 : i32
    %c0_i32_0 = arith.constant 0 : i32
    %c0_i32_1 = arith.constant 0 : i32
    return %c0_i32, %c0_i32_0 : i32, i32
  }
  func.func @transform_6(%arg0: i32, %arg1: i32) -> (i32, i32) {
    %c0_i32 = arith.constant 0 : i32
    %c0_i32_0 = arith.constant 0 : i32
    %c0_i32_1 = arith.constant 0 : i32
    return %c0_i32, %c0_i32_0 : i32, i32
  }
  func.func @transform_7(%arg0: i32, %arg1: i32) -> (i32, i32) {
    %c0_i32 = arith.constant 0 : i32
    %c0_i32_0 = arith.constant 0 : i32
    %c0_i32_1 = arith.constant 0 : i32
    return %c0_i32, %c0_i32_0 : i32, i32
  }
  func.func @transform_8(%arg0: i32, %arg1: i32) -> (i32, i32) {
    %c0_i32 = arith.constant 0 : i32
    %c0_i32_0 = arith.constant 0 : i32
    %c0_i32_1 = arith.constant 0 : i32
    return %c0_i32, %c0_i32_0 : i32, i32
  }
  func.func @transform_9(%arg0: i32, %arg1: i32) -> (i32, i32, i32) {
    %c0_i32 = arith.constant 0 : i32
    %c0_i32_0 = arith.constant 0 : i32
    return %arg0, %arg1, %c0_i32 : i32, i32, i32
  }
}

</mosaic_0001>

<bundles_post_ra>
// kernel: tpu_custom_call.1
= control target key start
LH: loop header
LB: loop body
LE: loop exit
PB: predicated region body
PF: predicated region fallthrough
CT: control target
= control target key end

     0   :  { %s3028_s0 = inlined_call_operand.hbm [shape: bf16[2,8,32], index: 0, kind: input, shape index: {}]   ;;  %s3029_s1 = inlined_call_operand.hbm [shape: bf16[32,32], index: 1, kind: input, shape index: {}]   ;;  %s3030_s2 = inlined_call_operand.hbm [shape: bf16[32,32], index: 2, kind: input, shape index: {}]   ;;  %s3031_s3 = inlined_call_operand.hbm [shape: bf16[32,32], index: 3, kind: input, shape index: {}]   ;;  %s3032_s4 = inlined_call_operand.vmem [shape: f32[1,32], index: 4, kind: input, shape index: {}]   ;;  %s3033_s5 = inlined_call_operand.vmem [shape: f32[1,32], index: 5, kind: input, shape index: {}]   ;;  %s3034_s6 = inlined_call_operand.vmem [shape: f32[1,32], index: 6, kind: input, shape index: {}]   ;;  %s3035_s7 = inlined_call_operand.vmem [shape: bf16[32,32], index: 7, kind: input, shape index: {}]   ;;  %s3036_s8 = inlined_call_operand.vmem [shape: f32[1,32], index: 8, kind: input, shape index: {}]   ;;  %s3037_s9 = inlined_call_operand.hbm [shape: f32[2,8,32], index: 9, kind: output, shape index: {}]  }
   0x1   :  { %3046 = sst [smem:[#allocation22_spill]] %s3035_s7 }
   0x2   :  { %3047 = sst [smem:[#allocation23_spill]] %s3036_s8 }
   0x3   :  { %3048 = sst [smem:[#allocation24_spill]] %s3037_s9 }
   0x4   :  { %14 = vsyncpa [#allocation7], 0 }
   0x5   :  { %16 = vsyncpa [#allocation7 + $0x1], 0 }
   0x6   :  { %17 = vsyncpa [#allocation10], 0 }
   0x7   :  { %18 = vsyncpa [#allocation13], 0 }
   0x8   :  { %19 = vsyncpa [#allocation8], 0 }
   0x9   :  { %21 = vsyncpa [#allocation8 + $0x1], 0  ;;  %s2548_s30 = smov 0   ;;  %s2550_s10 = smov 0  }
   0xa   :  { %s2552_s11 = smov 0   ;;  %s2554_s12 = smov 0  }
   0xb   :  { %s2556_s13 = smov 0   ;;  %s2558_s14 = smov 0  }
   0xc LB: > { %3049 = sst [smem:[#allocation19_spill]] %s2453_s30  ;;  %s1839_s15 = sadd.s32 4294967295, %s2473_s14   ;;  %s2473_s14 = sphi %s2558_s14, %s27_s14   ;;  %s2469_s13 = sphi %s2556_s13, %s3077_s13   ;;  %s2465_s12 = sphi %s2554_s12, %s3076_s12   ;;  %s2461_s11 = sphi %s2552_s11, %s3075_s11   ;;  %s2457_s10 = sphi %s2550_s10, %s3074_s10   ;;  %s2453_s30 = sphi %s2548_s30, %s3073_s30  }
   0xd   : > { %3050 = sst [smem:[#allocation20_spill]] %s2465_s12  ;;  %s1840_s16 = sadd.s32 4294967294, %s2473_s14  }
   0xe   : > { %p59_p0 = scmp.ne.s32.totalorder %s2457_s10, %s2453_s30  ;;  %p2582_p1 = scmp.eq.s32.totalorder %s1839_s15, 0 }
   0xf   : > { %p2586_p2 = scmp.eq.s32.totalorder %s1839_s15, 1  ;;  %p259_p3 = scmp.eq.s32.totalorder %s1840_s16, 1 }
  0x10   : > { %s3051_s17 = scalar_select %p2582_p1, 1, 0 }
  0x11   : > { %s3052_s18 = scalar_select %p2586_p2, 1, 0 }
  0x12   : > { %p2592_p4 = por %p2582_p1, %p59_p0  ;;  %p1841_p5 = scmp.ge.s32.totalorder %s2473_s14, 1 }
  0x13   : > { %p2597_p6 = por %p259_p3, %p59_p0  ;;  %p266_p7 = scmp.lt.s32.totalorder %s2473_s14, 3 }
  0x14   : > { %s3053_s19 = scalar_select %p2592_p4, 1, 0 }
  0x15   : > { %s3054_s20 = scalar_select %p2597_p6, 1, 0 }
  0x16   : > { %p2602_p8 = pnand %p1841_p5, %p266_p7  ;;  %s2475_s22 = smov [#allocation9]  }
  0x17   : > { %3055 = sst [smem:[#allocation21_spill]] %s3054_s20  ;;  %s278_s23 = sshll.u32 %s2475_s22, 4  ;;  %s2606_s23 = int_to_ptr.vmem [resolvable:$true] %s278_s23 }
  0x18   : > { %s3056_s21 = scalar_select %p2602_p8, 1, 0 }
  0x19   : > { %p2113_p9 = pneg %p2602_p8  ;;  %s2476_s25 = smov [#allocation11]  }
  0x1a   : > { %s291_s26 = sshll.u32 %s2476_s25, 4  ;;  %s2477_s27 = smov [#allocation12]   ;;  %s2617_s26 = int_to_ptr.vmem [resolvable:$true] %s291_s26 }
  0x1b   : > { %p2613_p11 = pnand %p2113_p9, %p2582_p1  ;;  %s2619_s28 = sshll.u32 %s2477_s27, 4  ;;  %s305_s28 = int_to_ptr.vmem [resolvable:$true] %s2619_s28 }
  0x1c   : > { %s2269_s16 = scalar_lea.hbm %s3029_s1, 256 }
  0x1d   : > { %p2270_p12 = scmp.ne.s32.totalorder %s3029_s1, %s2269_s16  ;;  %p2629_p13 = pneg %p2613_p11 }
  0x1e   : > { %p2276_p5 = scmp.lt.u32.totalorder %s2269_s16, %s3029_s1 }
  0x1f   : > { %p2272_p0 = pnand %p2629_p13, %p2270_p12 }
  0x21   : > { %p2273_p3 = pneg %p2272_p0 }
  0x23   : > { %p2278_p7 = pnand %p2276_p5, %p2273_p3 }
  0x25   : > { %2281 = shalt.err (!%p2278_p7)
}
  0x26   : > { %s2282_s20 = scalar_lea.vmem %s2606_s23, 256  ;;  %p2290_p1 = scmp.lt.s32.totalorder %s2606_s23, %s2606_s23 }
  0x27   : > { %p2283_p9 = scmp.ne.s32.totalorder %s2606_s23, %s2282_s20  ;;  %p2291_p4 = scmp.lt.s32.totalorder %s2282_s20, %s2282_s20 }
  0x29   : > { %p2285_p10 = pnand %p2283_p9, %p2629_p13  ;;  %p2292_p12 = por %p2291_p4, %p2290_p1 }
  0x2b   : > { %p2286_p6 = pneg %p2285_p10 }
  0x2d   : > { %p2293_p0 = pnand %p2292_p12, %p2286_p6 }
  0x2f   : > { %2296 = shalt.err (!%p2293_p0)
}
  0x30   : > { %s2478_s29 = smov 64   ;;  %s2479_s15 = smov 4  }
  0x31   : > { %2116 = dma.hbm_to_vmem [thread:$0]  (!%p2613_p11), %s3029_s1, 256, %s2606_s23, [#allocation10], %s2478_s29, %s2478_s29, %s2479_s15  }
  0x32   : > { %s2297_s20 = scalar_lea.hbm %s3030_s2, 256 }
  0x33   : > { %p2298_p1 = scmp.ne.s32.totalorder %s3030_s2, %s2297_s20  ;;  %p2304_p10 = scmp.lt.u32.totalorder %s2297_s20, %s3030_s2 }
  0x35   : > { %p2300_p4 = pnand %p2298_p1, %p2629_p13 }
  0x37   : > { %p2301_p6 = pneg %p2300_p4 }
  0x39   : > { %p2306_p3 = pnand %p2304_p10, %p2301_p6 }
  0x3b   : > { %2309 = shalt.err (!%p2306_p3)
}
  0x3c   : > { %s2310_s23 = scalar_lea.vmem %s2617_s26, 256  ;;  %p2318_p12 = scmp.lt.s32.totalorder %s2617_s26, %s2617_s26 }
  0x3d   : > { %p2311_p5 = scmp.ne.s32.totalorder %s2617_s26, %s2310_s23  ;;  %p2319_p0 = scmp.lt.s32.totalorder %s2310_s23, %s2310_s23 }
  0x3f   : > { %p2313_p7 = pnand %p2311_p5, %p2629_p13  ;;  %p2320_p1 = por %p2319_p0, %p2318_p12 }
  0x41   : > { %p2314_p9 = pneg %p2313_p7 }
  0x43   : > { %p2321_p4 = pnand %p2320_p1, %p2314_p9 }
  0x45   : > { %2324 = shalt.err (!%p2321_p4)
}
  0x46   : > { %2119 = dma.hbm_to_vmem [thread:$0]  (!%p2613_p11), %s3030_s2, 256, %s2617_s26, [#allocation10], %s2478_s29, %s2478_s29, %s2479_s15  }
  0x47   : > { %s2325_s16 = scalar_lea.hbm %s3031_s3, 256 }
  0x48   : > { %p2326_p6 = scmp.ne.s32.totalorder %s3031_s3, %s2325_s16  ;;  %p2332_p5 = scmp.lt.u32.totalorder %s2325_s16, %s3031_s3 }
  0x4a   : > { %p2328_p10 = pnand %p2326_p6, %p2629_p13 }
  0x4c   : > { %p2329_p3 = pneg %p2328_p10 }
  0x4e   : > { %p2334_p7 = pnand %p2332_p5, %p2329_p3 }
  0x50   : > { %2337 = shalt.err (!%p2334_p7)
}
  0x51   : > { %s2338_s23 = scalar_lea.vmem %s305_s28, 256  ;;  %p2346_p1 = scmp.lt.s32.totalorder %s305_s28, %s305_s28 }
  0x52   : > { %p2339_p9 = scmp.ne.s32.totalorder %s305_s28, %s2338_s23  ;;  %p2347_p4 = scmp.lt.s32.totalorder %s2338_s23, %s2338_s23 }
  0x54   : > { %p2341_p12 = pnand %p2339_p9, %p2629_p13  ;;  %p2348_p8 = por %p2347_p4, %p2346_p1 }
  0x56   : > { %p2342_p0 = pneg %p2341_p12 }
  0x58   : > { %p2349_p2 = pnand %p2348_p8, %p2342_p0 }
  0x5a   : > { %2352 = shalt.err (!%p2349_p2)
}
  0x5b   : > { %2122 = dma.hbm_to_vmem [thread:$0]  (!%p2613_p11), %s3031_s3, 256, %s305_s28, [#allocation13], %s2478_s29, %s2478_s29, %s2479_s15  }
  0x5c   : > { %s46_s30 = sadd.s32 1, %s2461_s11  ;;  %s39_s24 = sadd.s32 1, %s2469_s13 }
  0x5d   : > { %p53_p2 = scmp.ne.s32.totalorder %s2461_s11, %s2457_s10  ;;  %p41_p8 = scmp.ge.s32.totalorder %s39_s24, 2 }
  0x5e   : > { %p54_p13 = scmp.eq.s32.totalorder %s2473_s14, 0  ;;  %p3059_p6 = scmp.ne.s32.totalorder %s3052_s18, 0 }
  0x5f   : > { %p2134_p3 = scmp.lt.s32.totalorder %s2473_s14, 2  ;;  %s3079_s24 = smov (%p41_p8, %s39_s24), 0 }
  0x60   : > { %p2708_p10 = por %p3059_p6, %p53_p2  ;;  %p55_p5 = por %p54_p13, %p53_p2 }
  0x61   : > { %s333_s9 = sand.u32 1, %s2461_s11   ;;  %s43_s12 = ssub.s32 %s2469_s13, %s3079_s24 }
  0x62   : > { %p44_p7 = scmp.eq.s32.totalorder %s43_s12, 0  ;;  %s1846_s28 = sshll.u32 %s333_s9, 2 }
  0x63   : > { %s1847_s29 = sshll.u32 %s2469_s13, 6  ;;  %s337_s25 = scalar_lea.vmem [#allocation6], %s1846_s28 }
  0x64   : > { %s2720_s15 = scalar_select %p44_p7, %s2461_s11, %s46_s30  }
  0x65   : > { %s2725_s18 = scalar_lea.hbm %s3028_s0, %s1847_s29  ;;  %s344_s27 = sshll.u32 %s337_s25, 4  ;;  %s2727_s27 = int_to_ptr.vmem [resolvable:$true] %s344_s27 }
  0x66   : > { %p2731_p11 = pnand %p2134_p3, %p55_p5  ;;  %s334_s23 = scalar_lea.sflag [#allocation7], %s333_s9 }
  0x67   : > { %s2353_s26 = scalar_lea.hbm %s2725_s18, 64  ;;  %s2358_s12 = scalar_lea.hbm %s3028_s0, 128 }
  0x68   : > { %p2354_p9 = scmp.ne.s32.totalorder %s2725_s18, %s2353_s26  ;;  %p2355_p12 = pneg %p2731_p11 }
  0x69   : > { %p2359_p4 = scmp.lt.u32.totalorder %s2725_s18, %s3028_s0  ;;  %p2360_p2 = scmp.lt.u32.totalorder %s2358_s12, %s2353_s26 }
  0x6a   : > { %p2356_p0 = pnand %p2355_p12, %p2354_p9  ;;  %p2362_p13 = scmp.lt.u32.totalorder %s2353_s26, %s2725_s18 }
  0x6b   : > { %p2361_p8 = por %p2360_p2, %p2359_p4 }
  0x6c   : > { %p2357_p1 = pneg %p2356_p0 }
  0x6d   : > { %p2363_p6 = por %p2362_p13, %p2361_p8 }
  0x6f   : > { %p2364_p3 = pnand %p2363_p6, %p2357_p1 }
  0x71   : > { %2367 = shalt.err (!%p2364_p3)
}
  0x72   : > { %s2368_s9 = scalar_lea.vmem %s2727_s27, 64  ;;  %s2480_s16 = smov [#allocation6]  }
  0x73   : > { %p2369_p5 = scmp.ne.s32.totalorder %s2727_s27, %s2368_s9  ;;  %s2373_s22 = sshll.u32 %s2480_s16, 4  ;;  %s2374_s22 = int_to_ptr.vmem [resolvable:$false] %s2373_s22 }
  0x74   : > { %s2375_s25 = scalar_lea.vmem %s2374_s22, 128  ;;  %p2376_p0 = scmp.lt.s32.totalorder %s2727_s27, %s2374_s22 }
  0x75   : > { %p2371_p7 = pnand %p2369_p5, %p2355_p12  ;;  %p2377_p4 = scmp.lt.s32.totalorder %s2375_s25, %s2368_s9 }
  0x77   : > { %p2372_p9 = pneg %p2371_p7  ;;  %p2378_p2 = por %p2377_p4, %p2376_p0 }
  0x79   : > { %p2379_p8 = pnand %p2378_p2, %p2372_p9 }
  0x7b   : > { %2382 = shalt.err (!%p2379_p8)
}
  0x7c   : > { %2126 = dma.hbm_to_vmem [thread:$0]  (!%p2731_p11), %s2725_s18, 64, %s2727_s27, %s334_s23  }
  0x7d   : > { %p3062_p1 = scmp.ne.s32.totalorder %s3056_s21, 0 }
  0x7e   : > { %s2763_s26 = sand.u32 (!%p3062_p1), 1, %s2457_s10   ;;  %p3063_p12 = scmp.ne.s32.totalorder (!%p3062_p1), %s3053_s19, 0 }
  0x7f   : > { %353 = sbr.rel (%p3062_p1) target bundleno = 1677 (0x68d), region = 56  ;;  %s1849_s7 = sshll.u32 (!%p3062_p1), %s2763_s26, 2 }
  0x80   : > { %s356_s30 = scalar_lea.sflag (!%p3062_p1), [#allocation7], %s2763_s26  ;;  %s359_s12 = scalar_lea.vmem (!%p3062_p1), [#allocation6], %s1849_s7 }
  0x86   : > { %2436 = dma.done.wait (%p3063_p12), %s356_s30, 64  }
  0x87   : > { %2438 = vsyncadd (%p3063_p12), %s356_s30, 4294967232  ;;  %p3064_p13 = scmp.ne.s32.totalorder %s3051_s17, 0 }
  0x89   : > { %2440 = dma.done.wait (%p3064_p13), [#allocation10], 512  }
  0x8a   : > { %2442 = vsyncadd (%p3064_p13), [#allocation10], 4294966784 }
  0x8b   : > { %2444 = dma.done.wait (%p3064_p13), [#allocation13], 256  }
  0x8c   : > { %2446 = vsyncadd (%p3064_p13), [#allocation13], 4294967040  ;;  %v2481_v0 = vmov 0.0   ;;  %vm2482_vm0 = vmmov 0   ;;  %v2208_v1 = vld [vmem:[#allocation11] sm:$0xff]   ;;  %v2209_v2 = vld [vmem:[#allocation11 + $0x8] sm:$0xff]  }
  0x8d   : > { %1969 = vmatprep.subr.bf16.mxu0 %v2481_v0  ;;  %1973 = vmatprep.mubr.msk.bf16.mxu0 %vm2482_vm0, %v2481_v0  ;;  %v411_v3 = vld [vmem:[%s359_s12] sm:$0xf]  ;;  %vm435_vm1 = vcmask 261120   ;;  %v2210_v4 = vld [vmem:[#allocation9] sm:$0xff]   ;;  %v2211_v5 = vld [vmem:[#allocation9 + $0x8] sm:$0xff]   ;;  %vm543_vm2 = vcmask 257024  }
  0x8e   : > { %1977 = vmatprep.subr.bf16.mxu1 %v2481_v0  ;;  %1981 = vmatprep.mubr.msk.bf16.mxu1 %vm2482_vm0, %v2481_v0  ;;  %v547_v6 = vld [vmem:[%s359_s12] sm:$0xf]  ;;  %v2212_v7 = vld [vmem:[#allocation12] sm:$0xff]   ;;  %v2213_v8 = vld [vmem:[#allocation12 + $0x8] sm:$0xff]   ;;  %vm621_vm3 = vcmask 31744   ;;  %s2483_s27 = smov 120  }
  0x8f   : > { %1970 = vmatpush3.bf16.msra.mxu0 %v2208_v1  ;;  %1978 = vmatpush3.bf16.msra.mxu1 %v2212_v7  ;;  %v1854_v9 = vld [vmem:[%s3033_s5] ss:$0 sm:$0xff]  ;;  %s2484_s20 = smov 124   ;;  %s2485_s23 = smov 116   ;;  %vm684_vm4 = vcmask 1043456   ;;  %vm668_vm5 = vcmask 64512  }
  0x90   : > { %1971 = vmatprep.subr.bf16.mxu0 %v2481_v0  ;;  %1979 = vmatprep.subr.bf16.mxu1 %v2481_v0  ;;  %v1862_v16 = vld [vmem:[%s3032_s4] ss:$0 sm:$0xff]  ;;  %s2486_s28 = smov 112   ;;  %s2487_s29 = smov 108   ;;  %vm729_vm6 = vcmask 27648   ;;  %vm860_vm7 = vcmask 60448  }
  0x91   : > { %s2488_s9 = smov 104   ;;  %s2489_s16 = smov 100   ;;  %v1858_v40 = vld [vmem:[%s3034_s6] ss:$0 sm:$0xff]  ;;  %vm991_vm8 = vcmask 93248   ;;  %vm1122_vm9 = vcmask 126048  }
  0x92   : > { %s2490_s7 = smov 4   ;;  %s2491_s30 = smov 8   ;;  %vm1253_vm10 = vcmask 158848   ;;  %vm1384_vm11 = vcmask 191648   ;;  %vm1515_vm12 = vcmask 224448   ;;  %vm1646_vm13 = vcmask 257248  }
  0x93   : > { %1972 = vmatpush3.bf16.msra.mxu0 %v2209_v2  ;;  %1980 = vmatpush3.bf16.msra.mxu1 %v2213_v8  ;;  %s2492_s12 = smov 12   ;;  %s2493_s17 = smov 16  }
  0x94   : > { %1985 = vmatprep.subr.bf16.mxu0 %v2481_v0  ;;  %1993 = vmatprep.subr.bf16.mxu1 %v2481_v0  ;;  %s2494_s19 = smov 20   ;;  %s3068_s18 = sld [smem:[#allocation24_spill]] }
  0x96   : > { %1974 = vmatmul.mubr.msk.bf16.vlgmr.msra.gmra.mrb[0].mxu0 %vm435_vm1, %v411_v3  ;;  %1982 = vmatmul.mubr.msk.bf16.vlgmr.msra.gmra.mrb[0].mxu1 %vm435_vm1, %v411_v3 }
  0x97   : > { %1986 = vmatpush3.bf16.msra.mxu0 %v2210_v4  ;;  %1989 = vmatprep.mubr.msk.bf16.mxu0 %vm2482_vm0, %v2481_v0 }
  0x98   : > { %1987 = vmatprep.subr.bf16.mxu0 %v2481_v0  ;;  %1995 = vmatprep.mubr.msk.bf16.mxu1 %vm2482_vm0, %v2481_v0 }
  0x9b   : > { %1988 = vmatpush3.bf16.msra.mxu0 %v2211_v5 }
  0x9c   : > { %1999 = vmatprep.subr.bf16.mxu0 %v2481_v0 }
  0x9e   : > { %1990 = vmatmul.mubr.msk.bf16.vlgmr.msra.gmra.mrb[4].mxu0 %vm435_vm1, %v547_v6 }
  0x9f   : > { %2001 = vmatprep.mubr.msk.bf16.mxu0 %vm2482_vm0, %v2481_v0 }
 0x169   : > { %v473_v10 = vpop.f32.mrb[0].mxu0  ;;  %v536_v41 = vpop.f32.mrb[0].mxu1 }
 0x16a   : > { %v474_v11 = vadd.f32 %v1854_v9, %v473_v10  ;;  %v1975_v12 = vpop.f32.mrb[1].mxu0  ;;  %v537_v42 = vadd.f32 %v1858_v40, %v536_v41  ;;  %v1983_v43 = vpop.f32.mrb[1].mxu1 }
 0x16b   : > { %v476_v13 = vpop.f32.mrb[2].mxu0  ;;  %v539_v44 = vpop.f32.mrb[2].mxu1 }
 0x16c   : > { %v542_v14 = vpack.c.bf16 %v474_v11, %v474_v11  ;;  %v1976_v15 = vpop.f32.mrb[3].mxu0  ;;  %v545_v45 = vpack.c.bf16 %v537_v42, %v537_v42  ;;  %v1984_v46 = vpop.f32.mrb[3].mxu1 }
 0x16e   : > { %544 = vst.msk [vmem:[#allocation2] sm:$0xf] %vm543_vm2, %v542_v14  ;;  %546 = vst.msk [vmem:[#allocation3] sm:$0xf] %vm543_vm2, %v545_v45 }
 0x171   : > { %v609_v17 = vpop.f32.mrb[4].mxu0 }
 0x172   : > { %v610_v18 = vadd.f32 %v1862_v16, %v609_v17  ;;  %v1991_v19 = vpop.f32.mrb[5].mxu0 }
 0x173   : > { %v612_v20 = vpop.f32.mrb[6].mxu0 }
 0x174   : > { %v615_v21 = vpack.c.bf16 %v610_v18, %v610_v18  ;;  %v1992_v22 = vpop.f32.mrb[7].mxu0 }
 0x175   : > { %v619_v23 = vld [vmem:[#allocation2] sm:$0xf]  ;;  %v620_v47 = vld [vmem:[#allocation3] sm:$0xf] }
 0x176   : > { %v2214_v24 = vld [vmem:[#allocation2] ss:$0 sps:$4 sm:$0xff]   ;;  %617 = vst.msk [vmem:[#allocation4] sm:$0xf] %vm543_vm2, %v615_v21  ;;  %v626_v25 = vsel %vm621_vm3, %v619_v23, 0  ;;  %v686_v48 = vsel %vm684_vm4, %v620_v47, 0 }
 0x177   : > { %v2215_v26 = vld [vmem:[#allocation2] ss:$0 sps:$4 sm:$0xff]   ;;  %1994 = vmatpush3.bf16.xpose.msra.mxu1 %v626_v25  ;;  %873 = vrot.lane.b32.xlu1 %v2214_v24, %s2483_s27 }
 0x178   : > { %742 = vrot.lane.b32.xlu0 %v2215_v26, %s2484_s20  ;;  %2005 = vmatprep.subr.bf16.mxu1 %v2481_v0  ;;  %v2219_v31 = vld [vmem:[#allocation2] ss:$0 sps:$4 sm:$0xff]  }
 0x179   : > { %v2221_v33 = vld [vmem:[#allocation2] ss:$0 sps:$4 sm:$0xff]   ;;  %2000 = vmatpush3.bf16.msra.mxu0 %v686_v48 }
 0x17a   : > { %v2223_v35 = vld [vmem:[#allocation2] ss:$0 sps:$4 sm:$0xff]   ;;  %2011 = vmatprep.subr.bf16.mxu0 %v2481_v0 }
 0x17b   : > { %v2225_v37 = vld [vmem:[#allocation2] ss:$0 sps:$4 sm:$0xff]  }
 0x17c   : > { %v2227_v39 = vld [vmem:[#allocation2] ss:$0 sps:$4 sm:$0xff]  }
 0x17d   : > { %v618_v27 = vld [vmem:[#allocation4] sm:$0xf] }
 0x17e   : > { %v2216_v28 = vld [vmem:[#allocation4] ss:$0 sps:$4 sm:$0xff]   ;;  %1996 = vmatmul.mubr.msk.bf16.vlgmr.msra.gmra.mrb[4].mxu1 %vm621_vm3, %v618_v27 }
 0x17f   : > { %v2217_v29 = vld [vmem:[#allocation4] ss:$0 sps:$4 sm:$0xff]   ;;  %868 = vrot.lane.b32.xlu1 %v2216_v28, %s2483_s27  ;;  %2007 = vmatprep.mubr.msk.bf16.mxu1 %vm2482_vm0, %v2481_v0 }
 0x180   : > { %737 = vrot.lane.b32.xlu0 %v2217_v29, %s2484_s20  ;;  %v2218_v30 = vld [vmem:[#allocation4] ss:$0 sps:$4 sm:$0xff]  }
 0x181   : > { %v2220_v32 = vld [vmem:[#allocation4] ss:$0 sps:$4 sm:$0xff]  }
 0x182   : > { %v2222_v34 = vld [vmem:[#allocation4] ss:$0 sps:$4 sm:$0xff]  }
 0x183   : > { %999 = vrot.lane.b32.xlu1 %v2218_v30, %s2485_s23  ;;  %v2224_v36 = vld [vmem:[#allocation4] ss:$0 sps:$4 sm:$0xff]  }
 0x184   : > { %1004 = vrot.lane.b32.xlu0 %v2219_v31, %s2485_s23  ;;  %v2226_v38 = vld [vmem:[#allocation4] ss:$0 sps:$4 sm:$0xff]  }
 0x187   : > { %1130 = vrot.lane.b32.xlu1 %v2220_v32, %s2486_s28 }
 0x188   : > { %1135 = vrot.lane.b32.xlu0 %v2221_v33, %s2486_s28 }
 0x18b   : > { %1261 = vrot.lane.b32.xlu1 %v2222_v34, %s2487_s29 }
 0x18c   : > { %1266 = vrot.lane.b32.xlu0 %v2223_v35, %s2487_s29 }
 0x18f   : > { %1392 = vrot.lane.b32.xlu1 %v2224_v36, %s2488_s9 }
 0x190   : > { %1397 = vrot.lane.b32.xlu0 %v2225_v37, %s2488_s9 }
 0x193   : > { %1523 = vrot.lane.b32.xlu1 %v2226_v38, %s2489_s16 }
 0x194   : > { %1528 = vrot.lane.b32.xlu0 %v2227_v39, %s2489_s16 }
 0x1e9   : > { %v874_v51 = vpop.permute.xlu1 %873 }
 0x1ea   : > { %v743_v49 = vpop.permute.xlu0 %742  ;;  %v879_v53 = vsel %vm621_vm3, %v874_v51, 0 }
 0x1eb   : > { %v748_v50 = vsel %vm621_vm3, %v743_v49, 0 }
 0x1ec   : > { %2006 = vmatpush3.bf16.xpose.msra.mxu1 %v748_v50 }
 0x1ed   : > { %2017 = vmatprep.subr.bf16.mxu1 %v2481_v0 }
 0x1f1   : > { %v869_v55 = vpop.permute.xlu1 %868 }
 0x1f2   : > { %v738_v52 = vpop.permute.xlu0 %737 }
 0x1f3   : > { %2008 = vmatmul.mubr.msk.bf16.vlgmr.msra.gmra.mrb[8].mxu1 %vm621_vm3, %v738_v52  ;;  %v2228_v52 = vld [vmem:[#allocation3] ss:$0 sps:$4 sm:$0xff]  }
 0x1f4   : > { %2018 = vmatpush3.bf16.xpose.msra.mxu1 %v879_v53  ;;  %2019 = vmatprep.mubr.msk.bf16.mxu1 %vm2482_vm0, %v2481_v0  ;;  %v2229_v53 = vld [vmem:[#allocation3] ss:$0 sps:$4 sm:$0xff]  }
 0x1f5   : > { %2029 = vmatprep.subr.bf16.mxu1 %v2481_v0  ;;  %v1000_v58 = vpop.permute.xlu1 %999 }
 0x1f6   : > { %v1005_v54 = vpop.permute.xlu0 %1004 }
 0x1f7   : > { %v1010_v56 = vsel %vm621_vm3, %v1005_v54, 0 }
 0x1f9   : > { %v1131_v61 = vpop.permute.xlu1 %1130 }
 0x1fa   : > { %v1136_v57 = vpop.permute.xlu0 %1135 }
 0x1fb   : > { %2020 = vmatmul.mubr.msk.bf16.vlgmr.msra.gmra.mrb[12].mxu1 %vm621_vm3, %v869_v55  ;;  %v1141_v59 = vsel %vm621_vm3, %v1136_v57, 0 }
 0x1fc   : > { %2030 = vmatpush3.bf16.xpose.msra.mxu1 %v1010_v56  ;;  %2031 = vmatprep.mubr.msk.bf16.mxu1 %vm2482_vm0, %v2481_v0 }
 0x1fd   : > { %2041 = vmatprep.subr.bf16.mxu1 %v2481_v0  ;;  %v1262_v1 = vpop.permute.xlu1 %1261 }
 0x1fe   : > { %v1267_v60 = vpop.permute.xlu0 %1266 }
 0x1ff   : > { %v1272_v62 = vsel %vm621_vm3, %v1267_v60, 0 }
 0x201   : > { %v1393_v4 = vpop.permute.xlu1 %1392 }
 0x202   : > { %v1398_v63 = vpop.permute.xlu0 %1397 }
 0x203   : > { %2032 = vmatmul.mubr.msk.bf16.vlgmr.msra.gmra.mrb[16].mxu1 %vm621_vm3, %v1000_v58  ;;  %v1403_v2 = vsel %vm621_vm3, %v1398_v63, 0 }
 0x204   : > { %2042 = vmatpush3.bf16.xpose.msra.mxu1 %v1141_v59  ;;  %2043 = vmatprep.mubr.msk.bf16.mxu1 %vm2482_vm0, %v2481_v0 }
 0x205   : > { %2053 = vmatprep.subr.bf16.mxu1 %v2481_v0  ;;  %v1524_v6 = vpop.permute.xlu1 %1523 }
 0x206   : > { %v1529_v3 = vpop.permute.xlu0 %1528 }
 0x207   : > { %v1534_v5 = vsel %vm621_vm3, %v1529_v3, 0 }
 0x20b   : > { %2044 = vmatmul.mubr.msk.bf16.vlgmr.msra.gmra.mrb[20].mxu1 %vm621_vm3, %v1131_v61 }
 0x20c   : > { %2054 = vmatpush3.bf16.xpose.msra.mxu1 %v1272_v62  ;;  %2055 = vmatprep.mubr.msk.bf16.mxu1 %vm2482_vm0, %v2481_v0 }
 0x20d   : > { %2065 = vmatprep.subr.bf16.mxu1 %v2481_v0 }
 0x213   : > { %2056 = vmatmul.mubr.msk.bf16.vlgmr.msra.gmra.mrb[24].mxu1 %vm621_vm3, %v1262_v1 }
 0x214   : > { %2066 = vmatpush3.bf16.xpose.msra.mxu1 %v1403_v2  ;;  %2067 = vmatprep.mubr.msk.bf16.mxu1 %vm2482_vm0, %v2481_v0 }
 0x215   : > { %2077 = vmatprep.subr.bf16.mxu1 %v2481_v0 }
 0x21b   : > { %2068 = vmatmul.mubr.msk.bf16.vlgmr.msra.gmra.mrb[28].mxu1 %vm621_vm3, %v1393_v4 }
 0x21c   : > { %2078 = vmatpush3.bf16.xpose.msra.mxu1 %v1534_v5  ;;  %2079 = vmatprep.mubr.msk.bf16.mxu1 %vm2482_vm0, %v2481_v0 }
 0x21d   : > { %2089 = vmatprep.subr.bf16.mxu1 %v2481_v0 }
 0x223   : > { %2080 = vmatmul.mubr.msk.bf16.vlgmr.msra.gmra.mrb[32].mxu1 %vm621_vm3, %v1524_v6 }
 0x224   : > { %2093 = vmatprep.mubr.msk.bf16.mxu1 %vm2482_vm0, %v2481_v0 }
 0x251   : > { %v662_v7 = vpop.f32.mrb[4].mxu1 }
 0x252   : > { %v1997_v8 = vpop.f32.mrb[5].mxu1  ;;  %v669_v9 = vsel %vm668_vm5, %v662_v7, -inf }
 0x253   : > { %670 = vmax.xlane.f32.xlu0 %v669_v9  ;;  %v665_v10 = vpop.f32.mrb[6].mxu1  ;;  %v2230_v8 = vld [vmem:[#allocation3] ss:$0 sps:$4 sm:$0xff]  }
 0x254   : > { %v1998_v11 = vpop.f32.mrb[7].mxu1 }
 0x2c6   : > { %v784_v12 = vpop.f32.mrb[8].mxu1 }
 0x2c7   : > { %v2009_v13 = vpop.f32.mrb[9].mxu1  ;;  %v790_v14 = vsel %vm668_vm5, %v784_v12, -inf }
 0x2c8   : > { %791 = vmax.xlane.f32.xlu1 %v790_v14  ;;  %v787_v15 = vpop.f32.mrb[10].mxu1 }
 0x2c9   : > { %v2010_v16 = vpop.f32.mrb[11].mxu1 }
 0x2ce   : > { %v915_v17 = vpop.f32.mrb[12].mxu1 }
 0x2cf   : > { %v2021_v18 = vpop.f32.mrb[13].mxu1  ;;  %v921_v19 = vsel %vm668_vm5, %v915_v17, -inf }
 0x2d0   : > { %922 = vmax.xlane.f32.xlu0 %v921_v19  ;;  %v918_v20 = vpop.f32.mrb[14].mxu1 }
 0x2d1   : > { %v2022_v21 = vpop.f32.mrb[15].mxu1 }
 0x2d6   : > { %v1046_v22 = vpop.f32.mrb[16].mxu1 }
 0x2d7   : > { %v2033_v23 = vpop.f32.mrb[17].mxu1  ;;  %v1052_v24 = vsel %vm668_vm5, %v1046_v22, -inf }
 0x2d8   : > { %1053 = vmax.xlane.f32.xlu0 %v1052_v24  ;;  %v1049_v25 = vpop.f32.mrb[18].mxu1 }
 0x2d9   : > { %v2034_v26 = vpop.f32.mrb[19].mxu1 }
 0x2de   : > { %v2872_v27 = vpop.f32.mrb[20].mxu1 }
 0x2df   : > { %v2045_v28 = vpop.f32.mrb[21].mxu1  ;;  %v1183_v29 = vsel %vm668_vm5, %v2872_v27, -inf }
 0x2e0   : > { %v671_v30 = vpop.xlane.xlu0 %670  ;;  %1184 = vmax.xlane.f32.xlu1 %v1183_v29  ;;  %v1180_v31 = vpop.f32.mrb[22].mxu1 }
 0x2e1   : > { %v672_v32 = vsub.f32 %v662_v7, %v671_v30  ;;  %v2046_v33 = vpop.f32.mrb[23].mxu1 }
 0x2e3   : > { %v673_v34 = vmul.f32 1.442695, %v672_v32 }
 0x2e5   : > { %2237 = vpow2.f32 %v673_v34  ;;  %v2232_v34 = vld [vmem:[#allocation3] ss:$0 sps:$4 sm:$0xff]  }
 0x2e6   : > { %v2876_v35 = vpop.f32.mrb[24].mxu1 }
 0x2e7   : > { %v2057_v36 = vpop.f32.mrb[25].mxu1  ;;  %v1314_v37 = vsel %vm668_vm5, %v2876_v35, -inf }
 0x2e8   : > { %1315 = vmax.xlane.f32.xlu0 %v1314_v37  ;;  %v1311_v38 = vpop.f32.mrb[26].mxu1  ;;  %v2234_v36 = vld [vmem:[#allocation3] ss:$0 sps:$4 sm:$0xff]  }
 0x2e9   : > { %v2058_v39 = vpop.f32.mrb[27].mxu1 }
 0x2ee   : > { %v2880_v40 = vpop.f32.mrb[28].mxu1 }
 0x2ef   : > { %v2069_v41 = vpop.f32.mrb[29].mxu1  ;;  %v1445_v42 = vsel %vm668_vm5, %v2880_v40, -inf  ;;  %v2238_v43 = vpop.eup %2237 }
 0x2f0   : > { %1446 = vmax.xlane.f32.xlu1 %v1445_v42  ;;  %v1442_v44 = vpop.f32.mrb[30].mxu1  ;;  %v675_v46 = vsel %vm668_vm5, %v2238_v43, 0.0 }
 0x2f1   : > { %v2070_v45 = vpop.f32.mrb[31].mxu1 }
 0x2f4   : > { %676 = vadd.xlane.f32.xlu1 %v675_v46 }
 0x2f6   : > { %v1570_v47 = vpop.f32.mrb[32].mxu1 }
 0x2f7   : > { %v2081_v48 = vpop.f32.mrb[33].mxu1  ;;  %v1576_v49 = vsel %vm668_vm5, %v1570_v47, -inf }
 0x2f8   : > { %1577 = vmax.xlane.f32.xlu0 %v1576_v49  ;;  %v1573_v50 = vpop.f32.mrb[34].mxu1 }
 0x2f9   : > { %v2082_v51 = vpop.f32.mrb[35].mxu1 }
 0x305   : > { %936 = vrot.lane.b32.xlu1 %v2228_v52, %s2483_s27  ;;  %s3065_s27 = sld [smem:[#allocation22_spill]] }
 0x30e   : > { %805 = vrot.lane.b32.xlu0 %v2229_v53, %s2484_s20 }
 0x355   : > { %v792_v54 = vpop.xlane.xlu1 %791 }
 0x356   : > { %v793_v55 = vsub.f32 %v784_v12, %v792_v54  ;;  %v2231_v12 = vld [vmem:[#allocation3] ss:$0 sps:$4 sm:$0xff]  }
 0x358   : > { %v794_v56 = vmul.f32 1.442695, %v793_v55 }
 0x35a   : > { %2239 = vpow2.f32 %v794_v56 }
 0x35d   : > { %v923_v57 = vpop.xlane.xlu0 %922 }
 0x35e   : > { %v924_v58 = vsub.f32 %v915_v17, %v923_v57 }
 0x360   : > { %v925_v59 = vmul.f32 1.442695, %v924_v58 }
 0x362   : > { %2241 = vpow2.f32 %v925_v59 }
 0x364   : > { %v2888_v60 = vpop.eup %2239 }
 0x365   : > { %v1054_v61 = vpop.xlane.xlu0 %1053  ;;  %v796_v62 = vsel %vm668_vm5, %v2888_v60, 0.0 }
 0x366   : > { %v1055_v63 = vsub.f32 %v1046_v22, %v1054_v61  ;;  %797 = vadd.xlane.f32.xlu0 %v796_v62 }
 0x368   : > { %v1056_v1 = vmul.f32 1.442695, %v1055_v63 }
 0x36a   : > { %2243 = vpow2.f32 %v1056_v1 }
 0x36c   : > { %v2892_v2 = vpop.eup %2241 }
 0x36d   : > { %v927_v3 = vsel %vm668_vm5, %v2892_v2, 0.0  ;;  %v1185_v6 = vpop.xlane.xlu1 %1184 }
 0x36e   : > { %928 = vadd.xlane.f32.xlu1 %v927_v3  ;;  %v1186_v14 = vsub.f32 %v2872_v27, %v1185_v6 }
 0x370   : > { %v1187_v18 = vmul.f32 1.442695, %v1186_v14 }
 0x374   : > { %v2896_v4 = vpop.eup %2243 }
 0x375   : > { %v1058_v5 = vsel %vm668_vm5, %v2896_v4, 0.0  ;;  %v1316_v10 = vpop.xlane.xlu0 %1315 }
 0x376   : > { %1059 = vadd.xlane.f32.xlu0 %v1058_v5  ;;  %v1317_v19 = vsub.f32 %v2876_v35, %v1316_v10  ;;  %v2233_v35 = vld [vmem:[#allocation3] ss:$0 sps:$4 sm:$0xff]  }
 0x378   : > { %v1318_v22 = vmul.f32 1.442695, %v1317_v19 }
 0x37d   : > { %v1447_v7 = vpop.xlane.xlu1 %1446 }
 0x37e   : > { %v1448_v21 = vsub.f32 %v2880_v40, %v1447_v7 }
 0x37f   : > { %1067 = vrot.lane.b32.xlu1 %v2230_v8, %s2485_s23  ;;  %s1717_s23 = scalar_lea.sflag [#allocation8], %s2763_s26 }
 0x380   : > { %v1449_v24 = vmul.f32 1.442695, %v1448_v21 }
 0x381   : > { %v677_v9 = vpop.xlane.xlu1 %676 }
 0x382   : > { %2245 = vrcp.f32 %v677_v9 }
 0x383   : > { %2247 = vpow2.f32 %v1187_v18 }
 0x384   : > { %2249 = vpow2.f32 %v1318_v22 }
 0x385   : > { %v1578_v11 = vpop.xlane.xlu0 %1577  ;;  %2251 = vpow2.f32 %v1449_v24  ;;  %v937_v38 = vpop.permute.xlu1 %936 }
 0x386   : > { %v1579_v23 = vsub.f32 %v1570_v47, %v1578_v11 }
 0x388   : > { %v1580_v25 = vmul.f32 1.442695, %v1579_v23 }
 0x389   : > { %v806_v16 = vpop.permute.xlu0 %805 }
 0x38a   : > { %v811_v20 = vsel %vm684_vm4, %v806_v16, 0  ;;  %2253 = vpow2.f32 %v1580_v25 }
 0x38c   : > { %1198 = vrot.lane.b32.xlu0 %v2231_v12, %s2486_s28  ;;  %v2246_v13 = vpop.eup %2245  ;;  %s2495_s28 = smov 24  }
 0x38d   : > { %v679_v15 = vmul.f32 %v2246_v13, %v2238_v43  ;;  %v2248_v26 = vpop.eup %2247  ;;  %v942_v43 = vsel %vm684_vm4, %v937_v38, 0 }
 0x38e   : > { %v1189_v27 = vsel %vm668_vm5, %v2248_v26, 0.0  ;;  %v2911_v28 = vpop.eup %2249 }
 0x38f   : > { %v680_v17 = vpack.c.bf16 %v679_v15, %v679_v15  ;;  %v2913_v29 = vpop.eup %2251  ;;  %v1320_v30 = vsel %vm668_vm5, %v2911_v28, 0.0 }
 0x390   : > { %v1451_v32 = vsel %vm668_vm5, %v2913_v29, 0.0 }
 0x391   : > { %2002 = vmatmul.mubr.msk.bf16.vlgmr.msra.gmra.mrb[8].mxu0 %vm668_vm5, %v680_v17 }
 0x392   : > { %2012 = vmatpush3.bf16.msra.mxu0 %v811_v20  ;;  %2013 = vmatprep.mubr.msk.bf16.mxu0 %vm2482_vm0, %v2481_v0 }
 0x393   : > { %2023 = vmatprep.subr.bf16.mxu0 %v2481_v0 }
 0x394   : > { %v2917_v31 = vpop.eup %2253 }
 0x395   : > { %v1582_v33 = vsel %vm668_vm5, %v2917_v31, 0.0 }
 0x3a3   : > { %1190 = vadd.xlane.f32.xlu1 %v1189_v27 }
 0x3a7   : > { %1321 = vadd.xlane.f32.xlu1 %v1320_v30 }
 0x3ab   : > { %1452 = vadd.xlane.f32.xlu0 %v1451_v32  ;;  %1583 = vadd.xlane.f32.xlu1 %v1582_v33 }
 0x3bc   : > { %1329 = vrot.lane.b32.xlu1 %v2232_v34, %s2487_s29  ;;  %s2496_s29 = smov 28  }
 0x3c1   : > { %1460 = vrot.lane.b32.xlu0 %v2233_v35, %s2488_s9  ;;  %s3066_s9 = sld [smem:[#allocation20_spill]] }
 0x3c5   : > { %1591 = vrot.lane.b32.xlu0 %v2234_v36, %s2489_s16  ;;  %s1853_s16 = sshll.u32 %s2763_s26, 3 }
 0x3f3   : > { %v798_v37 = vpop.xlane.xlu0 %797 }
 0x3f4   : > { %2255 = vrcp.f32 %v798_v37 }
 0x3fb   : > { %v929_v39 = vpop.xlane.xlu1 %928 }
 0x3fc   : > { %2257 = vrcp.f32 %v929_v39 }
 0x3fe   : > { %v2256_v40 = vpop.eup %2255 }
 0x3ff   : > { %v800_v41 = vmul.f32 %v2256_v40, %v2888_v60  ;;  %v1068_v47 = vpop.permute.xlu1 %1067 }
 0x400   : > { %v1073_v49 = vsel %vm684_vm4, %v1068_v47, 0 }
 0x401   : > { %v801_v42 = vpack.c.bf16 %v800_v41, %v800_v41 }
 0x403   : > { %2014 = vmatmul.mubr.msk.bf16.vlgmr.msra.gmra.mrb[12].mxu0 %vm668_vm5, %v801_v42  ;;  %v1060_v44 = vpop.xlane.xlu0 %1059 }
 0x404   : > { %2024 = vmatpush3.bf16.msra.mxu0 %v942_v43  ;;  %2259 = vrcp.f32 %v1060_v44  ;;  %2025 = vmatprep.mubr.msk.bf16.mxu0 %vm2482_vm0, %v2481_v0  ;;  %v2235_v44 = vld [vmem:[%s3065_s27] sm:$0xff]  }
 0x405   : > { %2035 = vmatprep.subr.bf16.mxu0 %v2481_v0  ;;  %2090 = vmatpush3.bf16.msra.mxu1 %v2235_v44 }
 0x406   : > { %v2258_v45 = vpop.eup %2257  ;;  %2091 = vmatprep.subr.bf16.mxu1 %v2481_v0 }
 0x407   : > { %v931_v46 = vmul.f32 %v2258_v45, %v2892_v2  ;;  %v1199_v52 = vpop.permute.xlu0 %1198 }
 0x408   : > { %v1204_v54 = vsel %vm684_vm4, %v1199_v52, 0 }
 0x409   : > { %v932_v48 = vpack.c.bf16 %v931_v46, %v931_v46  ;;  %v2236_v46 = vld [vmem:[%s3065_s27 + $0x8] sm:$0xff]  }
 0x40a   : > { %2092 = vmatpush3.bf16.msra.mxu1 %v2236_v46 }
 0x40b   : > { %2026 = vmatmul.mubr.msk.bf16.vlgmr.msra.gmra.mrb[16].mxu0 %vm668_vm5, %v932_v48 }
 0x40c   : > { %2036 = vmatpush3.bf16.msra.mxu0 %v1073_v49  ;;  %2037 = vmatprep.mubr.msk.bf16.mxu0 %vm2482_vm0, %v2481_v0 }
 0x40d   : > { %2047 = vmatprep.subr.bf16.mxu0 %v2481_v0 }
 0x40e   : > { %v2260_v50 = vpop.eup %2259 }
 0x40f   : > { %v1062_v51 = vmul.f32 %v2260_v50, %v2896_v4 }
 0x411   : > { %v1063_v53 = vpack.c.bf16 %v1062_v51, %v1062_v51 }
 0x413   : > { %2038 = vmatmul.mubr.msk.bf16.vlgmr.msra.gmra.mrb[20].mxu0 %vm668_vm5, %v1063_v53 }
 0x414   : > { %2048 = vmatpush3.bf16.msra.mxu0 %v1204_v54  ;;  %2049 = vmatprep.mubr.msk.bf16.mxu0 %vm2482_vm0, %v2481_v0 }
 0x415   : > { %2059 = vmatprep.subr.bf16.mxu0 %v2481_v0 }
 0x430   : > { %v1191_v55 = vpop.xlane.xlu1 %1190 }
 0x431   : > { %2261 = vrcp.f32 %v1191_v55 }
 0x434   : > { %v1322_v56 = vpop.xlane.xlu1 %1321 }
 0x435   : > { %2263 = vrcp.f32 %v1322_v56 }
 0x438   : > { %v1584_v57 = vpop.xlane.xlu1 %1583  ;;  %v1453_v58 = vpop.xlane.xlu0 %1452 }
 0x439   : > { %2265 = vrcp.f32 %v1453_v58 }
 0x43a   : > { %2267 = vrcp.f32 %v1584_v57 }
 0x43b   : > { %v2262_v59 = vpop.eup %2261 }
 0x43c   : > { %v1193_v60 = vmul.f32 %v2262_v59, %v2248_v26  ;;  %v1330_v61 = vpop.permute.xlu1 %1329  ;;  %v1461_v3 = vpop.permute.xlu0 %1460 }
 0x43d   : > { %v1335_v1 = vsel %vm684_vm4, %v1330_v61, 0  ;;  %v1466_v6 = vsel %vm684_vm4, %v1461_v3, 0 }
 0x43e   : > { %v1194_v62 = vpack.c.bf16 %v1193_v60, %v1193_v60 }
 0x43f   : > { %v2264_v63 = vpop.eup %2263 }
 0x440   : > { %2050 = vmatmul.mubr.msk.bf16.vlgmr.msra.gmra.mrb[24].mxu0 %vm668_vm5, %v1194_v62  ;;  %v1324_v2 = vmul.f32 %v2264_v63, %v2911_v28  ;;  %v1592_v8 = vpop.permute.xlu0 %1591 }
 0x441   : > { %2060 = vmatpush3.bf16.msra.mxu0 %v1335_v1  ;;  %2061 = vmatprep.mubr.msk.bf16.mxu0 %vm2482_vm0, %v2481_v0  ;;  %v1597_v11 = vsel %vm684_vm4, %v1592_v8, 0 }
 0x442   : > { %2071 = vmatprep.subr.bf16.mxu0 %v2481_v0  ;;  %v1325_v4 = vpack.c.bf16 %v1324_v2, %v1324_v2 }
 0x443   : > { %v2266_v5 = vpop.eup %2265 }
 0x444   : > { %v1455_v7 = vmul.f32 %v2266_v5, %v2913_v29  ;;  %v2268_v10 = vpop.eup %2267 }
 0x445   : > { %v1586_v12 = vmul.f32 %v2268_v10, %v2917_v31 }
 0x446   : > { %v1456_v9 = vpack.c.bf16 %v1455_v7, %v1455_v7 }
 0x447   : > { %v1587_v13 = vpack.c.bf16 %v1586_v12, %v1586_v12 }
 0x448   : > { %2062 = vmatmul.mubr.msk.bf16.vlgmr.msra.gmra.mrb[28].mxu0 %vm668_vm5, %v1325_v4 }
 0x449   : > { %2072 = vmatpush3.bf16.msra.mxu0 %v1466_v6  ;;  %2073 = vmatprep.mubr.msk.bf16.mxu0 %vm2482_vm0, %v2481_v0 }
 0x44a   : > { %2083 = vmatprep.subr.bf16.mxu0 %v2481_v0 }
 0x450   : > { %2074 = vmatmul.mubr.msk.bf16.vlgmr.msra.gmra.mrb[32].mxu0 %vm668_vm5, %v1456_v9 }
 0x451   : > { %2084 = vmatpush3.bf16.msra.mxu0 %v1597_v11  ;;  %2085 = vmatprep.mubr.msk.bf16.mxu0 %vm2482_vm0, %v2481_v0 }
 0x458   : > { %2086 = vmatmul.mubr.msk.bf16.vlgmr.msra.gmra.mrb[36].mxu0 %vm668_vm5, %v1587_v13 }
 0x464   : > { %v722_v14 = vpop.f32.mrb[8].mxu0 }
 0x465   : > { %v728_v15 = vpack.c.bf16 %v722_v14, %v722_v14  ;;  %v2003_v16 = vpop.f32.mrb[9].mxu0 }
 0x466   : > { %v725_v17 = vpop.f32.mrb[10].mxu0 }
 0x467   : > { %730 = vst.msk [vmem:[#allocation5] sm:$0xf] %vm729_vm6, %v728_v15  ;;  %v2004_v18 = vpop.f32.mrb[11].mxu0 }
 0x4d6   : > { %v847_v19 = vpop.f32.mrb[12].mxu0 }
 0x4d7   : > { %v1918_v20 = vpack.c.bf16 %v847_v19, %v847_v19  ;;  %v2015_v21 = vpop.f32.mrb[13].mxu0 }
 0x4d8   : > { %v850_v22 = vpop.f32.mrb[14].mxu0 }
 0x4d9   : > { %857 = vrot.lane.b32.xlu1 %v1918_v20, %s2490_s7  ;;  %v2016_v23 = vpop.f32.mrb[15].mxu0  ;;  %s3067_s7 = sld [smem:[#allocation23_spill]] }
 0x4de   : > { %v978_v24 = vpop.f32.mrb[16].mxu0 }
 0x4df   : > { %v1919_v25 = vpack.c.bf16 %v978_v24, %v978_v24  ;;  %v2027_v26 = vpop.f32.mrb[17].mxu0  ;;  %v1910_v63 = vld [vmem:[%s3067_s7] ss:$0 sm:$0xff] }
 0x4e0   : > { %v981_v27 = vpop.f32.mrb[18].mxu0 }
 0x4e1   : > { %988 = vrot.lane.b32.xlu0 %v1919_v25, %s2491_s30  ;;  %v2028_v28 = vpop.f32.mrb[19].mxu0  ;;  %s1915_s30 = sshll.u32 %s3066_s9, 7 }
 0x4e2   : > { %s2978_s20 = scalar_lea.hbm %s3068_s18, %s1915_s30 }
 0x4e6   : > { %v1109_v29 = vpop.f32.mrb[20].mxu0 }
 0x4e7   : > { %v1920_v30 = vpack.c.bf16 %v1109_v29, %v1109_v29  ;;  %v2039_v31 = vpop.f32.mrb[21].mxu0 }
 0x4e8   : > { %v1112_v32 = vpop.f32.mrb[22].mxu0 }
 0x4e9   : > { %1119 = vrot.lane.b32.xlu1 %v1920_v30, %s2492_s12  ;;  %v2040_v33 = vpop.f32.mrb[23].mxu0  ;;  %s405_s12 = scalar_lea.vmem [#allocation14], %s1853_s16 }
 0x513   : > { %v1240_v34 = vpop.f32.mrb[24].mxu0 }
 0x514   : > { %v1921_v35 = vpack.c.bf16 %v1240_v34, %v1240_v34  ;;  %v2051_v36 = vpop.f32.mrb[25].mxu0 }
 0x515   : > { %v1243_v37 = vpop.f32.mrb[26].mxu0 }
 0x516   : > { %1250 = vrot.lane.b32.xlu0 %v1921_v35, %s2493_s17  ;;  %v2052_v38 = vpop.f32.mrb[27].mxu0  ;;  %s1731_s17 = sshll.u32 %s405_s12, 4  ;;  %s2980_s17 = int_to_ptr.vmem [resolvable:$true] %s1731_s17 }
 0x51b   : > { %v1371_v39 = vpop.f32.mrb[28].mxu0 }
 0x51c   : > { %v1922_v40 = vpack.c.bf16 %v1371_v39, %v1371_v39  ;;  %v2063_v41 = vpop.f32.mrb[29].mxu0 }
 0x51d   : > { %v1374_v42 = vpop.f32.mrb[30].mxu0 }
 0x51e   : > { %1381 = vrot.lane.b32.xlu1 %v1922_v40, %s2494_s19  ;;  %v2064_v43 = vpop.f32.mrb[31].mxu0 }
 0x523   : > { %v1502_v45 = vpop.f32.mrb[32].mxu0 }
 0x524   : > { %v1923_v47 = vpack.c.bf16 %v1502_v45, %v1502_v45  ;;  %v2075_v48 = vpop.f32.mrb[33].mxu0 }
 0x525   : > { %v1505_v49 = vpop.f32.mrb[34].mxu0 }
 0x526   : > { %1512 = vrot.lane.b32.xlu0 %v1923_v47, %s2495_s28  ;;  %v2076_v50 = vpop.f32.mrb[35].mxu0  ;;  %s2383_s28 = scalar_lea.vmem %s2980_s17, 128 }
 0x527   : > { %p2384_p11 = scmp.ne.s32.totalorder %s2980_s17, %s2383_s28 }
 0x529   : > { %p2385_p6 = pnand %p2384_p11, %p2708_p10 }
 0x52b   : > { %v1633_v51 = vpop.f32.mrb[36].mxu0  ;;  %p2386_p3 = pneg %p2385_p6 }
 0x52c   : > { %v1924_v52 = vpack.c.bf16 %v1633_v51, %v1633_v51  ;;  %v2087_v53 = vpop.f32.mrb[37].mxu0 }
 0x52d   : > { %v1636_v54 = vpop.f32.mrb[38].mxu0 }
 0x52e   : > { %1643 = vrot.lane.b32.xlu1 %v1924_v52, %s2496_s29  ;;  %v2088_v55 = vpop.f32.mrb[39].mxu0  ;;  %s2497_s29 = smov [#allocation14]  }
 0x52f   : > { %s2387_s9 = sshll.u32 %s2497_s29, 4  ;;  %s2388_s9 = int_to_ptr.vmem [resolvable:$false] %s2387_s9 }
 0x530   : > { %s2389_s16 = scalar_lea.vmem %s2388_s9, 256  ;;  %p2390_p5 = scmp.lt.s32.totalorder %s2980_s17, %s2388_s9 }
 0x531   : > { %p2391_p7 = scmp.lt.s32.totalorder %s2389_s16, %s2383_s28 }
 0x533   : > { %p2392_p9 = por %p2391_p7, %p2390_p5 }
 0x535   : > { %p2393_p0 = pnand %p2392_p9, %p2386_p3 }
 0x54b   : > { %v858_v56 = vpop.permute.xlu1 %857 }
 0x54c   : > { %861 = vst.msk [vmem:[#allocation5] sm:$0xf] %vm860_vm7, %v858_v56 }
 0x553   : > { %v989_v57 = vpop.permute.xlu0 %988 }
 0x554   : > { %992 = vst.msk [vmem:[#allocation5] sm:$0xf] %vm991_vm8, %v989_v57 }
 0x55b   : > { %v1120_v0 = vpop.permute.xlu1 %1119 }
 0x55c   : > { %1123 = vst.msk [vmem:[#allocation5] sm:$0xf] %vm1122_vm9, %v1120_v0 }
 0x588   : > { %v1251_v58 = vpop.permute.xlu0 %1250 }
 0x589   : > { %1254 = vst.msk [vmem:[#allocation5] sm:$0xf] %vm1253_vm10, %v1251_v58 }
 0x590   : > { %v1382_v59 = vpop.permute.xlu1 %1381 }
 0x591   : > { %1385 = vst.msk [vmem:[#allocation5] sm:$0xf] %vm1384_vm11, %v1382_v59 }
 0x598   : > { %v1513_v60 = vpop.permute.xlu0 %1512 }
 0x599   : > { %1516 = vst.msk [vmem:[#allocation5] sm:$0xf] %vm1515_vm12, %v1513_v60 }
 0x5a0   : > { %v1644_v61 = vpop.permute.xlu1 %1643 }
 0x5a1   : > { %1647 = vst.msk [vmem:[#allocation5] sm:$0xf] %vm1646_vm13, %v1644_v61 }
 0x5a8   : > { %v1648_v62 = vld [vmem:[#allocation5] sm:$0xf] }
 0x5a9   : > { %2094 = vmatmul.mubr.msk.bf16.vlgmr.msra.gmra.mrb[36].mxu1 %vm435_vm1, %v1648_v62 }
 0x67c   : > { %v1709_v1 = vpop.f32.mrb[36].mxu1 }
 0x67d   : > { %v1710_v2 = vadd.f32 %v1910_v63, %v1709_v1  ;;  %v2095_v3 = vpop.f32.mrb[37].mxu1 }
 0x67e   : > { %v1712_v4 = vpop.f32.mrb[38].mxu1 }
 0x67f   : > { %v2096_v5 = vpop.f32.mrb[39].mxu1  ;;  %1715 = vst.msk [vmem:[%s405_s12] sm:$0xff] %vm435_vm1, %v1710_v2 }
 0x680   : > { %2396 = shalt.err (!%p2393_p0)
}
 0x681   : > { %s2397_s26 = scalar_lea.hbm %s2978_s20, 128  ;;  %s2401_s7 = scalar_lea.hbm %s3068_s18, 256 }
 0x682   : > { %p2398_p4 = scmp.ne.s32.totalorder %s2978_s20, %s2397_s26  ;;  %p2402_p1 = scmp.lt.u32.totalorder %s2978_s20, %s3068_s18 }
 0x683   : > { %p2403_p12 = scmp.lt.u32.totalorder %s2401_s7, %s2397_s26  ;;  %p2405_p11 = scmp.lt.u32.totalorder %s2397_s26, %s2978_s20 }
 0x684   : > { %p2399_p2 = pnand %p2398_p4, %p2708_p10 }
 0x685   : > { %p2404_p13 = por %p2403_p12, %p2402_p1 }
 0x686   : > { %p2400_p8 = pneg %p2399_p2 }
 0x687   : > { %p2406_p6 = por %p2405_p11, %p2404_p13 }
 0x689   : > { %p2407_p3 = pnand %p2406_p6, %p2400_p8 }
 0x68b   : > { %2410 = shalt.err (!%p2407_p3)
}
 0x68c   : > { %2111 = dma.vmem_to_hbm [thread:$0]  (%p2708_p10), %s2980_s17, 128, %s2978_s20, %s1717_s23  }
 0x68d PF: > { %s3069_s19 = sld [smem:[#allocation19_spill]]  ;;  %s3070_s21 = sld [smem:[#allocation21_spill]] }
 0x68e   : > { %p3072_p7 = scmp.ge.s32.totalorder %s2473_s14, 2 }
 0x693   : > { %s1743_s28 = sand.u32 1, %s3069_s19   ;;  %p3071_p5 = scmp.ne.s32.totalorder %s3070_s21, 0 }
 0x694   : > { %s1744_s29 = scalar_lea.sflag [#allocation8], %s1743_s28 }
 0x695   : > { %p2128_p9 = pnand %p3072_p7, %p3071_p5 }
 0x697   : > { %2448 = dma.done.wait (!%p2128_p9), %s1744_s29, 128  }
 0x698   : > { %2450 = vsyncadd (!%p2128_p9), %s1744_s29, 4294967168  ;;  %s27_s14 = sadd.s32 1, %s2473_s14   ;;  %s3073_s30 = smov %s2457_s10 }
 0x699   : > { %p24_p0 = scmp.ge.s32.totalorder %s27_s14, 4   ;;  %s3074_s10 = smov %s2461_s11 }
 0x69a   : > { %s3075_s11 = smov %s2720_s15  ;;  %s3076_s12 = smov %s2469_s13 }
 0x69b   : > { %s3077_s13 = smov %s3079_s24  ;;  %26 = sbr.rel (!%p24_p0) target bundleno = 12 (0xc), region = 117 }
 0x6a2   :  { %1749 = vsyncpa [#allocation7], 1 }
 0x6a3   :  { %1751 = vsyncpa [#allocation7 + $0x1], 1 }
 0x6a4   :  { %1752 = vsyncpa [#allocation10], 1 }
 0x6a5   :  { %1753 = vsyncpa [#allocation13], 1 }
 0x6a6   :  { %1754 = vsyncpa [#allocation8], 1 }
 0x6a7   :  { %1756 = vsyncpa [#allocation8 + $0x1], 1 }

</bundles_post_ra>
